<compile_context>
chip_gen: v5e
topology: v5e:2x2
jax: 0.10.0
libtpu: 0.0.40
codegen_flags: <defaults>
</compile_context>

<pallas_src>
import functools

import numpy as np
import jax
import jax.numpy as jnp
from jax.experimental import pallas as pl
from jax.experimental.pallas import tpu as pltpu


def _bilinear_upsample_matrix(in_size: int, out_size: int) -> np.ndarray:
    """(out_size, in_size) matrix reproducing torch.nn.Upsample(mode='bilinear',
    align_corners=False) along one axis, applied as `out = M @ in`."""
    m = np.zeros((out_size, in_size), dtype=np.float64)
    for i in range(out_size):
        src = (i + 0.5) * in_size / out_size - 0.5
        src = max(src, 0.0)                 # PyTorch clamps negative source coords
        i0 = min(int(np.floor(src)), in_size - 1)
        i1 = min(i0 + 1, in_size - 1)
        lam = src - i0
        m[i, i0] += 1.0 - lam
        m[i, i1] += lam
    return m


def _upsample_conv_kernel(w_ref, x_ref, uw_ref, uh_ref, o_ref, *,
                          c_in, h, oh, co_blk):
    """One (image, output-channel-group) grid step.

    w_ref : SMEM (C_out, C_in) f32   -- 1x1 conv weight (scalar prefetch)
    x_ref : VMEM (1, C_in*H, W)      -- one image, channel*row stacked in sublanes
    uw_ref: VMEM (W, oW)             -- width-upsample matrix (grid-invariant)
    uh_ref: VMEM (oH, H)             -- height-upsample matrix (grid-invariant)
    o_ref : VMEM (1, co_blk*oH, oW)  -- this step's output channels
    """
    g = pl.program_id(1)

    x = x_ref[0]                                                      # (C_in*H, W)
    # For exactness when fed f32, force the accurate multi-pass MXU path.
    prec = jax.lax.Precision.HIGHEST if x.dtype == jnp.float32 else None

    # Width upsample: one MXU dot shared by every output channel of this step.
    xw = jnp.dot(x, uw_ref[...], precision=prec,
                 preferred_element_type=jnp.float32)                  # (C_in*H, oW) f32

    for o in range(co_blk):                                           # static loop
        oc = g * co_blk + o
        # 1x1 conv for output channel `oc`: scalar-weighted sum over input
        # channels (VPU; f32 accumulation). Static, aligned value slices.
        s = w_ref[oc, 0] * xw[0:h]
        for c in range(1, c_in):
            s = s + w_ref[oc, c] * xw[c * h:(c + 1) * h]              # (H, oW) f32
        # Height upsample for this channel (MXU, f32 accumulation).
        out_o = jnp.dot(uh_ref[...], s.astype(uh_ref.dtype), precision=prec,
                        preferred_element_type=jnp.float32)           # (oH, oW)
        o_ref[0, o * oh:(o + 1) * oh, :] = out_o.astype(o_ref.dtype)


def upsample_forward(x, conv_w, scale_factor=2, *, compute_dtype=jnp.bfloat16,
                     co_block=None):
    """Forward of UpSample: bilinear upsample (align_corners=False) + 1x1 conv.

    Args:
      x:       (B, C_in, H, W) NCHW input.
      conv_w:  (C_out, C_in, 1, 1) Conv2d weight (kernel_size=1, bias=False).
      scale_factor: spatial upsampling factor (default 2).
      compute_dtype: dtype fed to the matmuls (default bf16, recommended on
        TPU; pass None to keep x.dtype).  Accumulation is always f32.
      co_block: output channels per grid step (None -> heuristic).
    Returns:
      (B, C_out, H*scale, W*scale) in x.dtype.
    """
    B, C_in, H, W = x.shape
    C_out = conv_w.shape[0]
    assert conv_w.shape == (C_out, C_in, 1, 1), conv_w.shape
    oH = int(round(H * scale_factor))
    oW = int(round(W * scale_factor))
    out_dtype = x.dtype
    if compute_dtype is None:
        compute_dtype = x.dtype

    # Small per-axis upsample matrices (compile-time constants, ~KiB).
    uh_j = jnp.asarray(_bilinear_upsample_matrix(H, oH), compute_dtype)    # (oH, H)
    uw_j = jnp.asarray(_bilinear_upsample_matrix(W, oW).T, compute_dtype)  # (W, oW)
    # 1x1 conv weight as plain (C_out, C_in) scalars -> SMEM (scalar prefetch).
    w2d = conv_w[:, :, 0, 0].astype(jnp.float32)

    # Output-channel grouping: second "parallel" grid axis.
    osize = jnp.dtype(out_dtype).itemsize
    if co_block is None:
        per_oc = oH * oW * osize
        co_block = int(max(1, min(C_out, (8 << 20) // max(per_oc, 1))))
        if B < 2 and C_out > 1:                 # keep >=2 steps for megacore
            co_block = min(co_block, max(1, C_out // 2))
        while C_out % co_block:
            co_block -= 1
    assert C_out % co_block == 0, (C_out, co_block)
    n_groups = C_out // co_block
    # Sublane alignment of the output block's second-to-last dim.
    min_sub = {4: 8, 2: 16, 1: 32}.get(osize, 8)
    if n_groups > 1 and (co_block * oH) % min_sub != 0:
        co_block, n_groups = C_out, 1

    # Free (contiguous) reshape NCHW -> (B, C_in*H, W); cast feeds the MXU at
    # its native bf16 rate and halves HBM traffic for this mem-bound op.
    x_c = x.reshape(B, C_in * H, W).astype(compute_dtype)

    # Generation-aware VMEM budget (v7x: 64 MiB physical, v5e/v6e: 128 MiB),
    # ~25% headroom left for the compiler.
    try:
        vmem_cap = int(pltpu.get_tpu_info().vmem_capacity_bytes)
    except Exception:
        vmem_cap = 64 * 1024 * 1024             # conservative (v7x per-core)
    vmem_limit = int(min(vmem_cap * 3 // 4, 100 * 1024 * 1024))

    csize = jnp.dtype(compute_dtype).itemsize
    flops = 2 * B * (C_in * H * W * oW            # width-upsample dot (MXU)
                     + C_out * C_in * H * oW      # 1x1 conv (VPU)
                     + C_out * oH * H * oW)       # height-upsample dots (MXU)
    bytes_accessed = (B * n_groups * C_in * H * W * csize   # x (re-read per group)
                      + B * C_out * oH * oW * osize         # output
                      + (W * oW + oH * H) * csize           # upsample matrices
                      + C_out * C_in * 4)                   # conv weight

    kernel = functools.partial(_upsample_conv_kernel,
                               c_in=C_in, h=H, oh=oH, co_blk=co_block)

    out2d = pl.pallas_call(
        kernel,
        out_shape=jax.ShapeDtypeStruct((B, C_out * oH, oW), out_dtype),
        grid_spec=pltpu.PrefetchScalarGridSpec(
            num_scalar_prefetch=1,               # w2d -> SMEM
            grid=(B, n_groups),
            in_specs=[
                # One image; index does not depend on g, so the block is not
                # re-DMA'd while sweeping output-channel groups.
                pl.BlockSpec((1, C_in * H, W), lambda b, g, w: (b, 0, 0)),
                # Grid-invariant upsample matrices (tiny, stay resident).
                pl.BlockSpec((W, oW), lambda b, g, w: (0, 0)),
                pl.BlockSpec((oH, H), lambda b, g, w: (0, 0)),
            ],
            out_specs=pl.BlockSpec((1, co_block * oH, oW),
                                   lambda b, g, w: (b, g, 0)),
        ),
        compiler_params=pltpu.CompilerParams(
            dimension_semantics=("parallel", "parallel"),
            vmem_limit_bytes=vmem_limit),
        cost_estimate=pl.CostEstimate(
            flops=flops, transcendentals=0, bytes_accessed=bytes_accessed),
    )(w2d, x_c, uw_j, uh_j)

    # Free reshape back to NCHW.
    return out2d.reshape(B, C_out, oH, oW)


def upsample_reference(x, conv_w, scale_factor=2):
    """float64 numpy reference in the module's op order: upsample, then conv."""
    x64 = np.asarray(x, np.float64)
    w64 = np.asarray(conv_w, np.float64)[:, :, 0, 0]
    _, _, H, W = x64.shape
    oH = int(round(H * scale_factor))
    oW = int(round(W * scale_factor))
    uh = _bilinear_upsample_matrix(H, oH)          # (oH, H)
    uw = _bilinear_upsample_matrix(W, oW)          # (oW, W)
    up = np.einsum('gh,bchw->bcgw', uh, x64)       # height upsample
    up = np.einsum('qw,bcgw->bcgq', uw, up)        # width upsample
    out = np.einsum('oc,bcgq->bogq', w64, up)      # 1x1 conv
    return out


if __name__ == "__main__":
    # Small demo shapes.  W=64 so the upsampled width oW=128 keeps every store
    # and intermediate lane-dense (full 128-lane vregs).
    B, C_in, C_out, H, W = 2, 4, 8, 16, 64
    scale = 2

    key = jax.random.PRNGKey(0)
    kx, kw = jax.random.split(key, 2)
    x = jax.random.normal(kx, (B, C_in, H, W), dtype=jnp.float32)
    conv_w = 0.1 * jax.random.normal(kw, (C_out, C_in, 1, 1), dtype=jnp.float32)

    ref = upsample_reference(x, conv_w, scale)

    # Exact-math check: f32 compute path (co_block=4 -> grid (2,2), two
    # parallel axes so a v7x chip's two TensorCores both get work).
    out_f32 = jax.block_until_ready(
        upsample_forward(x, conv_w, scale, compute_dtype=jnp.float32, co_block=4))
    assert out_f32.shape == (B, C_out, H * scale, W * scale), out_f32.shape
    err_f32 = float(np.max(np.abs(np.asarray(out_f32, np.float64) - ref)))
    assert err_f32 < 1e-3, err_f32

    # Recommended bf16-fed path (f32 accumulation); tolerance only covers the
    # bf16 rounding of inputs / intermediates vs the float64 reference.
    out_bf = jax.block_until_ready(upsample_forward(x, conv_w, scale, co_block=4))
    assert out_bf.shape == (B, C_out, H * scale, W * scale), out_bf.shape
    err_bf = float(np.max(np.abs(np.asarray(out_bf, np.float64) - ref)))
    assert err_bf < 5e-2, err_bf

    print("KERNEL_OK")
</pallas_src>

<mosaic_0001>
module attributes {stable_mosaic.version = 11 : i64} {
  func.func @_upsample_conv_kernel(%arg0: i32, %arg1: i32, %arg2: memref<8x4xf32, #tpu.memory_space<smem>>, %arg3: memref<1x64x64xf32, #tpu.memory_space<vmem>>, %arg4: memref<64x128xf32, #tpu.memory_space<vmem>>, %arg5: memref<32x16xf32, #tpu.memory_space<vmem>>, %arg6: memref<1x128x128xf32, #tpu.memory_space<vmem>>) attributes {dimension_semantics = [#tpu.dimension_semantics<parallel>, #tpu.dimension_semantics<parallel>], iteration_bounds = array<i64: 2, 2>, scalar_prefetch = 1 : i64, scratch_operands = 0 : i64, tpu.core_type = #tpu.core_type<tc>, window_params = [{transform_indices = @transform_0, window_bounds = array<i64: 1, 64, 64>}, {pipeline_mode = #tpu.pipeline_mode<synchronous>, transform_indices = @transform_1, window_bounds = array<i64: 64, 128>}, {pipeline_mode = #tpu.pipeline_mode<synchronous>, transform_indices = @transform_2, window_bounds = array<i64: 32, 16>}, {transform_indices = @transform_3, window_bounds = array<i64: 1, 128, 128>}]} {
    %c0 = arith.constant 0 : index
    %c0_0 = arith.constant 0 : index
    %c0_1 = arith.constant 0 : index
    %0 = vector.load %arg3[%c0, %c0_0, %c0_1] : memref<1x64x64xf32, #tpu.memory_space<vmem>>, vector<1x64x64xf32>
    %1 = vector.shape_cast %0 : vector<1x64x64xf32> to vector<64x64xf32>
    %c0_2 = arith.constant 0 : index
    %c0_3 = arith.constant 0 : index
    %2 = vector.load %arg4[%c0_2, %c0_3] : memref<64x128xf32, #tpu.memory_space<vmem>>, vector<64x128xf32>
    %cst = arith.constant dense<0.000000e+00> : vector<64x128xf32>
    %3 = tpu.matmul %1, %2, %cst {dimension_numbers = #tpu.dot_dimension_numbers<[1], [0], [0], [1], [0, 0, 1, 1], [], []>, precision = #tpu.contract_precision<fp32>} : vector<64x64xf32>, vector<64x128xf32>, vector<64x128xf32> -> vector<64x128xf32>
    %c4_i32 = arith.constant 4 : i32
    %4 = arith.muli %arg1, %c4_i32 : i32
    %c0_i32 = arith.constant 0 : i32
    %5 = arith.addi %4, %c0_i32 : i32
    %6 = arith.index_cast %5 : i32 to index
    %c0_4 = arith.constant 0 : index
    %7 = memref.load %arg2[%6, %c0_4] : memref<8x4xf32, #tpu.memory_space<smem>>
    %8 = vector.extract_strided_slice %3 {offsets = [0, 0], sizes = [16, 128], strides = [1, 1]} : vector<64x128xf32> to vector<16x128xf32>
    %9 = vector.broadcast %7 : f32 to vector<16x128xf32>
    %10 = arith.mulf %9, %8 : vector<16x128xf32>
    %11 = arith.index_cast %5 : i32 to index
    %c1 = arith.constant 1 : index
    %12 = memref.load %arg2[%11, %c1] : memref<8x4xf32, #tpu.memory_space<smem>>
    %13 = vector.extract_strided_slice %3 {offsets = [16, 0], sizes = [16, 128], strides = [1, 1]} : vector<64x128xf32> to vector<16x128xf32>
    %14 = vector.broadcast %12 : f32 to vector<16x128xf32>
    %15 = arith.mulf %14, %13 : vector<16x128xf32>
    %16 = arith.addf %10, %15 : vector<16x128xf32>
    %17 = arith.index_cast %5 : i32 to index
    %c2 = arith.constant 2 : index
    %18 = memref.load %arg2[%17, %c2] : memref<8x4xf32, #tpu.memory_space<smem>>
    %19 = vector.extract_strided_slice %3 {offsets = [32, 0], sizes = [16, 128], strides = [1, 1]} : vector<64x128xf32> to vector<16x128xf32>
    %20 = vector.broadcast %18 : f32 to vector<16x128xf32>
    %21 = arith.mulf %20, %19 : vector<16x128xf32>
    %22 = arith.addf %16, %21 : vector<16x128xf32>
    %23 = arith.index_cast %5 : i32 to index
    %c3 = arith.constant 3 : index
    %24 = memref.load %arg2[%23, %c3] : memref<8x4xf32, #tpu.memory_space<smem>>
    %25 = vector.extract_strided_slice %3 {offsets = [48, 0], sizes = [16, 128], strides = [1, 1]} : vector<64x128xf32> to vector<16x128xf32>
    %26 = vector.broadcast %24 : f32 to vector<16x128xf32>
    %27 = arith.mulf %26, %25 : vector<16x128xf32>
    %28 = arith.addf %22, %27 : vector<16x128xf32>
    %c0_5 = arith.constant 0 : index
    %c0_6 = arith.constant 0 : index
    %29 = vector.load %arg5[%c0_5, %c0_6] : memref<32x16xf32, #tpu.memory_space<vmem>>, vector<32x16xf32>
    %cst_7 = arith.constant dense<0.000000e+00> : vector<32x128xf32>
    %30 = tpu.matmul %29, %28, %cst_7 {dimension_numbers = #tpu.dot_dimension_numbers<[1], [0], [0], [1], [0, 0, 1, 1], [], []>, precision = #tpu.contract_precision<fp32>} : vector<32x16xf32>, vector<16x128xf32>, vector<32x128xf32> -> vector<32x128xf32>
    %c0_8 = arith.constant 0 : index
    %c0_9 = arith.constant 0 : index
    %c0_10 = arith.constant 0 : index
    %31 = vector.load %arg6[%c0_8, %c0_9, %c0_10] : memref<1x128x128xf32, #tpu.memory_space<vmem>>, vector<1x32x128xf32>
    %32 = vector.shape_cast %31 : vector<1x32x128xf32> to vector<32x128xf32>
    %33 = vector.shape_cast %30 : vector<32x128xf32> to vector<1x32x128xf32>
    tpu.vector_store %arg6[%c0_8, %c0_9, %c0_10], %33 {strides = array<i32>} : memref<1x128x128xf32, #tpu.memory_space<vmem>>, vector<1x32x128xf32>,
    %c4_i32_11 = arith.constant 4 : i32
    %34 = arith.muli %arg1, %c4_i32_11 : i32
    %c1_i32 = arith.constant 1 : i32
    %35 = arith.addi %34, %c1_i32 : i32
    %36 = arith.index_cast %35 : i32 to index
    %c0_12 = arith.constant 0 : index
    %37 = memref.load %arg2[%36, %c0_12] : memref<8x4xf32, #tpu.memory_space<smem>>
    %38 = vector.extract_strided_slice %3 {offsets = [0, 0], sizes = [16, 128], strides = [1, 1]} : vector<64x128xf32> to vector<16x128xf32>
    %39 = vector.broadcast %37 : f32 to vector<16x128xf32>
    %40 = arith.mulf %39, %38 : vector<16x128xf32>
    %41 = arith.index_cast %35 : i32 to index
    %c1_13 = arith.constant 1 : index
    %42 = memref.load %arg2[%41, %c1_13] : memref<8x4xf32, #tpu.memory_space<smem>>
    %43 = vector.extract_strided_slice %3 {offsets = [16, 0], sizes = [16, 128], strides = [1, 1]} : vector<64x128xf32> to vector<16x128xf32>
    %44 = vector.broadcast %42 : f32 to vector<16x128xf32>
    %45 = arith.mulf %44, %43 : vector<16x128xf32>
    %46 = arith.addf %40, %45 : vector<16x128xf32>
    %47 = arith.index_cast %35 : i32 to index
    %c2_14 = arith.constant 2 : index
    %48 = memref.load %arg2[%47, %c2_14] : memref<8x4xf32, #tpu.memory_space<smem>>
    %49 = vector.extract_strided_slice %3 {offsets = [32, 0], sizes = [16, 128], strides = [1, 1]} : vector<64x128xf32> to vector<16x128xf32>
    %50 = vector.broadcast %48 : f32 to vector<16x128xf32>
    %51 = arith.mulf %50, %49 : vector<16x128xf32>
    %52 = arith.addf %46, %51 : vector<16x128xf32>
    %53 = arith.index_cast %35 : i32 to index
    %c3_15 = arith.constant 3 : index
    %54 = memref.load %arg2[%53, %c3_15] : memref<8x4xf32, #tpu.memory_space<smem>>
    %55 = vector.extract_strided_slice %3 {offsets = [48, 0], sizes = [16, 128], strides = [1, 1]} : vector<64x128xf32> to vector<16x128xf32>
    %56 = vector.broadcast %54 : f32 to vector<16x128xf32>
    %57 = arith.mulf %56, %55 : vector<16x128xf32>
    %58 = arith.addf %52, %57 : vector<16x128xf32>
    %c0_16 = arith.constant 0 : index
    %c0_17 = arith.constant 0 : index
    %59 = vector.load %arg5[%c0_16, %c0_17] : memref<32x16xf32, #tpu.memory_space<vmem>>, vector<32x16xf32>
    %cst_18 = arith.constant dense<0.000000e+00> : vector<32x128xf32>
    %60 = tpu.matmul %59, %58, %cst_18 {dimension_numbers = #tpu.dot_dimension_numbers<[1], [0], [0], [1], [0, 0, 1, 1], [], []>, precision = #tpu.contract_precision<fp32>} : vector<32x16xf32>, vector<16x128xf32>, vector<32x128xf32> -> vector<32x128xf32>
    %c0_19 = arith.constant 0 : index
    %c32 = arith.constant 32 : index
    %c0_20 = arith.constant 0 : index
    %61 = vector.load %arg6[%c0_19, %c32, %c0_20] : memref<1x128x128xf32, #tpu.memory_space<vmem>>, vector<1x32x128xf32>
    %62 = vector.shape_cast %61 : vector<1x32x128xf32> to vector<32x128xf32>
    %63 = vector.shape_cast %60 : vector<32x128xf32> to vector<1x32x128xf32>
    tpu.vector_store %arg6[%c0_19, %c32, %c0_20], %63 {strides = array<i32>} : memref<1x128x128xf32, #tpu.memory_space<vmem>>, vector<1x32x128xf32>,
    %c4_i32_21 = arith.constant 4 : i32
    %64 = arith.muli %arg1, %c4_i32_21 : i32
    %c2_i32 = arith.constant 2 : i32
    %65 = arith.addi %64, %c2_i32 : i32
    %66 = arith.index_cast %65 : i32 to index
    %c0_22 = arith.constant 0 : index
    %67 = memref.load %arg2[%66, %c0_22] : memref<8x4xf32, #tpu.memory_space<smem>>
    %68 = vector.extract_strided_slice %3 {offsets = [0, 0], sizes = [16, 128], strides = [1, 1]} : vector<64x128xf32> to vector<16x128xf32>
    %69 = vector.broadcast %67 : f32 to vector<16x128xf32>
    %70 = arith.mulf %69, %68 : vector<16x128xf32>
    %71 = arith.index_cast %65 : i32 to index
    %c1_23 = arith.constant 1 : index
    %72 = memref.load %arg2[%71, %c1_23] : memref<8x4xf32, #tpu.memory_space<smem>>
    %73 = vector.extract_strided_slice %3 {offsets = [16, 0], sizes = [16, 128], strides = [1, 1]} : vector<64x128xf32> to vector<16x128xf32>
    %74 = vector.broadcast %72 : f32 to vector<16x128xf32>
    %75 = arith.mulf %74, %73 : vector<16x128xf32>
    %76 = arith.addf %70, %75 : vector<16x128xf32>
    %77 = arith.index_cast %65 : i32 to index
    %c2_24 = arith.constant 2 : index
    %78 = memref.load %arg2[%77, %c2_24] : memref<8x4xf32, #tpu.memory_space<smem>>
    %79 = vector.extract_strided_slice %3 {offsets = [32, 0], sizes = [16, 128], strides = [1, 1]} : vector<64x128xf32> to vector<16x128xf32>
    %80 = vector.broadcast %78 : f32 to vector<16x128xf32>
    %81 = arith.mulf %80, %79 : vector<16x128xf32>
    %82 = arith.addf %76, %81 : vector<16x128xf32>
    %83 = arith.index_cast %65 : i32 to index
    %c3_25 = arith.constant 3 : index
    %84 = memref.load %arg2[%83, %c3_25] : memref<8x4xf32, #tpu.memory_space<smem>>
    %85 = vector.extract_strided_slice %3 {offsets = [48, 0], sizes = [16, 128], strides = [1, 1]} : vector<64x128xf32> to vector<16x128xf32>
    %86 = vector.broadcast %84 : f32 to vector<16x128xf32>
    %87 = arith.mulf %86, %85 : vector<16x128xf32>
    %88 = arith.addf %82, %87 : vector<16x128xf32>
    %c0_26 = arith.constant 0 : index
    %c0_27 = arith.constant 0 : index
    %89 = vector.load %arg5[%c0_26, %c0_27] : memref<32x16xf32, #tpu.memory_space<vmem>>, vector<32x16xf32>
    %cst_28 = arith.constant dense<0.000000e+00> : vector<32x128xf32>
    %90 = tpu.matmul %89, %88, %cst_28 {dimension_numbers = #tpu.dot_dimension_numbers<[1], [0], [0], [1], [0, 0, 1, 1], [], []>, precision = #tpu.contract_precision<fp32>} : vector<32x16xf32>, vector<16x128xf32>, vector<32x128xf32> -> vector<32x128xf32>
    %c0_29 = arith.constant 0 : index
    %c64 = arith.constant 64 : index
    %c0_30 = arith.constant 0 : index
    %91 = vector.load %arg6[%c0_29, %c64, %c0_30] : memref<1x128x128xf32, #tpu.memory_space<vmem>>, vector<1x32x128xf32>
    %92 = vector.shape_cast %91 : vector<1x32x128xf32> to vector<32x128xf32>
    %93 = vector.shape_cast %90 : vector<32x128xf32> to vector<1x32x128xf32>
    tpu.vector_store %arg6[%c0_29, %c64, %c0_30], %93 {strides = array<i32>} : memref<1x128x128xf32, #tpu.memory_space<vmem>>, vector<1x32x128xf32>,
    %c4_i32_31 = arith.constant 4 : i32
    %94 = arith.muli %arg1, %c4_i32_31 : i32
    %c3_i32 = arith.constant 3 : i32
    %95 = arith.addi %94, %c3_i32 : i32
    %96 = arith.index_cast %95 : i32 to index
    %c0_32 = arith.constant 0 : index
    %97 = memref.load %arg2[%96, %c0_32] : memref<8x4xf32, #tpu.memory_space<smem>>
    %98 = vector.extract_strided_slice %3 {offsets = [0, 0], sizes = [16, 128], strides = [1, 1]} : vector<64x128xf32> to vector<16x128xf32>
    %99 = vector.broadcast %97 : f32 to vector<16x128xf32>
    %100 = arith.mulf %99, %98 : vector<16x128xf32>
    %101 = arith.index_cast %95 : i32 to index
    %c1_33 = arith.constant 1 : index
    %102 = memref.load %arg2[%101, %c1_33] : memref<8x4xf32, #tpu.memory_space<smem>>
    %103 = vector.extract_strided_slice %3 {offsets = [16, 0], sizes = [16, 128], strides = [1, 1]} : vector<64x128xf32> to vector<16x128xf32>
    %104 = vector.broadcast %102 : f32 to vector<16x128xf32>
    %105 = arith.mulf %104, %103 : vector<16x128xf32>
    %106 = arith.addf %100, %105 : vector<16x128xf32>
    %107 = arith.index_cast %95 : i32 to index
    %c2_34 = arith.constant 2 : index
    %108 = memref.load %arg2[%107, %c2_34] : memref<8x4xf32, #tpu.memory_space<smem>>
    %109 = vector.extract_strided_slice %3 {offsets = [32, 0], sizes = [16, 128], strides = [1, 1]} : vector<64x128xf32> to vector<16x128xf32>
    %110 = vector.broadcast %108 : f32 to vector<16x128xf32>
    %111 = arith.mulf %110, %109 : vector<16x128xf32>
    %112 = arith.addf %106, %111 : vector<16x128xf32>
    %113 = arith.index_cast %95 : i32 to index
    %c3_35 = arith.constant 3 : index
    %114 = memref.load %arg2[%113, %c3_35] : memref<8x4xf32, #tpu.memory_space<smem>>
    %115 = vector.extract_strided_slice %3 {offsets = [48, 0], sizes = [16, 128], strides = [1, 1]} : vector<64x128xf32> to vector<16x128xf32>
    %116 = vector.broadcast %114 : f32 to vector<16x128xf32>
    %117 = arith.mulf %116, %115 : vector<16x128xf32>
    %118 = arith.addf %112, %117 : vector<16x128xf32>
    %c0_36 = arith.constant 0 : index
    %c0_37 = arith.constant 0 : index
    %119 = vector.load %arg5[%c0_36, %c0_37] : memref<32x16xf32, #tpu.memory_space<vmem>>, vector<32x16xf32>
    %cst_38 = arith.constant dense<0.000000e+00> : vector<32x128xf32>
    %120 = tpu.matmul %119, %118, %cst_38 {dimension_numbers = #tpu.dot_dimension_numbers<[1], [0], [0], [1], [0, 0, 1, 1], [], []>, precision = #tpu.contract_precision<fp32>} : vector<32x16xf32>, vector<16x128xf32>, vector<32x128xf32> -> vector<32x128xf32>
    %c0_39 = arith.constant 0 : index
    %c96 = arith.constant 96 : index
    %c0_40 = arith.constant 0 : index
    %121 = vector.load %arg6[%c0_39, %c96, %c0_40] : memref<1x128x128xf32, #tpu.memory_space<vmem>>, vector<1x32x128xf32>
    %122 = vector.shape_cast %121 : vector<1x32x128xf32> to vector<32x128xf32>
    %123 = vector.shape_cast %120 : vector<32x128xf32> to vector<1x32x128xf32>
    tpu.vector_store %arg6[%c0_39, %c96, %c0_40], %123 {strides = array<i32>} : memref<1x128x128xf32, #tpu.memory_space<vmem>>, vector<1x32x128xf32>,
    return
  }
  func.func @transform_0(%arg0: i32, %arg1: i32, %arg2: memref<8x4xf32, #tpu.memory_space<smem>>) -> (i32, i32, i32) {
    %c0_i32 = arith.constant 0 : i32
    %c0_i32_0 = arith.constant 0 : i32
    %c0_i32_1 = arith.constant 0 : i32
    return %arg0, %c0_i32, %c0_i32_0 : i32, i32, i32
  }
  func.func @transform_1(%arg0: i32, %arg1: i32, %arg2: memref<8x4xf32, #tpu.memory_space<smem>>) -> (i32, i32) {
    %c0_i32 = arith.constant 0 : i32
    %c0_i32_0 = arith.constant 0 : i32
    %c0_i32_1 = arith.constant 0 : i32
    return %c0_i32, %c0_i32_0 : i32, i32
  }
  func.func @transform_2(%arg0: i32, %arg1: i32, %arg2: memref<8x4xf32, #tpu.memory_space<smem>>) -> (i32, i32) {
    %c0_i32 = arith.constant 0 : i32
    %c0_i32_0 = arith.constant 0 : i32
    %c0_i32_1 = arith.constant 0 : i32
    return %c0_i32, %c0_i32_0 : i32, i32
  }
  func.func @transform_3(%arg0: i32, %arg1: i32, %arg2: memref<8x4xf32, #tpu.memory_space<smem>>) -> (i32, i32, i32) {
    %c0_i32 = arith.constant 0 : i32
    %c0_i32_0 = arith.constant 0 : i32
    return %arg0, %arg1, %c0_i32 : i32, i32, i32
  }
}

</mosaic_0001>

<bundles_post_ra>
// kernel: tpu_custom_call.1
= control target key start
LH: loop header
LB: loop body
LE: loop exit
PB: predicated region body
PF: predicated region fallthrough
CT: control target
= control target key end

     0   :  { %s2393_s18 = smov [#allocation3]   ;;  %s3152_s0 = inlined_call_operand.vmem [shape: f32[8,4], index: 0, kind: input, shape index: {}]   ;;  %s3153_s1 = inlined_call_operand.hbm [shape: f32[2,64,64], index: 1, kind: input, shape index: {}]   ;;  %s3154_s2 = inlined_call_operand.hbm [shape: f32[64,128], index: 2, kind: input, shape index: {}]   ;;  %s3155_s3 = inlined_call_operand.vmem [shape: f32[32,16], index: 3, kind: input, shape index: {}]   ;;  %s3156_s4 = inlined_call_operand.hbm [shape: f32[2,256,128], index: 4, kind: output, shape index: {}]  }
   0x1   :  { %3167 = sst [smem:[#allocation20_spill]] %s3154_s2  ;;  %s10_s17 = sshll.u32 %s3152_s0, 4  ;;  %s11_s17 = int_to_ptr.vmem [resolvable:$true] %s10_s17 }
   0x2   :  { %3168 = sst [smem:[#allocation21_spill]] %s3156_s4 }
   0x3   :  { %13 = dma.vmem_to_smem %s11_s17, 128, %s2393_s18, [#allocation2] }
   0x4   :  { %2335 = dma.done.wait [#allocation2], 128 }
   0x5   :  { %2336 = vsyncadd [#allocation2], 4294967168 }
   0x6   :  { %16 = sfence }
   0x7   :  { %17 = vsyncpa [#allocation5], 0 }
   0x8   :  { %19 = vsyncpa [#allocation5 + $0x1], 0 }
   0x9   :  { %20 = vsyncpa [#allocation8], 0 }
   0xa   :  { %21 = vsyncpa [#allocation6], 0 }
   0xb   :  { %23 = vsyncpa [#allocation6 + $0x1], 0  ;;  %s2427_s19 = smov 0   ;;  %s2429_s20 = smov 0  }
   0xc   :  { %s2431_s21 = smov 0   ;;  %s2433_s22 = smov 0  }
   0xd   :  { %s2435_s0 = smov 0   ;;  %s2437_s23 = smov 0  }
   0xe   :  { %s2439_s24 = smov 0   ;;  %s2441_s25 = smov 0  }
   0xf   :  { %s2443_s26 = smov 0   ;;  %s2445_s27 = smov 0  }
  0x10   :  { %s2447_s28 = smov 0  }
  0x11 LB: > { %3169 = sst [smem:[#allocation14_spill]] %s2351_s19  ;;  %s2039_s29 = sadd.s32 4294967295, %s2391_s28   ;;  %s2391_s28 = sphi %s2447_s28, %s29_s28   ;;  %s2387_s27 = sphi %s2445_s27, %s3199_s27   ;;  %s2383_s26 = sphi %s2443_s26, %s3190_s26   ;;  %s2379_s25 = sphi %s2441_s25, %s3198_s25   ;;  %s2375_s24 = sphi %s2439_s24, %s3189_s24   ;;  %s2371_s23 = sphi %s2437_s23, %s3197_s23   ;;  %s2367_s0 = sphi %s2435_s0, %s3196_s0   ;;  %s2363_s22 = sphi %s2433_s22, %s3195_s22   ;;  %s2359_s21 = sphi %s2431_s21, %s3194_s21   ;;  %s2355_s20 = sphi %s2429_s20, %s3193_s20   ;;  %s2351_s19 = sphi %s2427_s19, %s3192_s19  }
  0x12   : > { %3170 = sst [smem:[#allocation15_spill]] %s2383_s26  ;;  %s2040_s30 = sadd.s32 4294967294, %s2391_s28  }
  0x13   : > { %p61_p0 = scmp.ne.s32.totalorder %s2367_s0, %s2363_s22  ;;  %p2483_p1 = scmp.eq.s32.totalorder %s2039_s29, 0 }
  0x14   : > { %p128_p2 = scmp.ne.s32.totalorder %s2359_s21, %s2355_s20  ;;  %p129_p3 = scmp.eq.s32.totalorder %s2039_s29, 3 }
  0x15   : > { %p2491_p4 = por %p2483_p1, %p61_p0  ;;  %p134_p5 = scmp.ne.s32.totalorder %s2355_s20, %s2351_s19 }
  0x16   : > { %p2497_p6 = por %p129_p3, %p128_p2  ;;  %p135_p7 = scmp.eq.s32.totalorder %s2040_s30, 3 }
  0x17   : > { %p2041_p8 = scmp.ge.s32.totalorder %s2391_s28, 1  ;;  %p142_p9 = scmp.lt.s32.totalorder %s2391_s28, 5 }
  0x18   : > { %s3173_s7 = scalar_select %p2497_p6, 1, 0 }
  0x19   : > { %p2503_p10 = por %p135_p7, %p134_p5  ;;  %p2507_p11 = pnand %p2041_p8, %p142_p9 }
  0x1a   : > { %3174 = sst [smem:[#allocation16_spill]] %s3173_s7  ;;  %s2394_s13 = smov [#allocation7]  }
  0x1b   : > { %s3175_s8 = scalar_select %p2503_p10, 1, 0 }
  0x1c   : > { %s3178_s2 = sld [smem:[#allocation20_spill]]  ;;  %p2081_p12 = pneg %p2507_p11 }
  0x1d   : > { %3176 = sst [smem:[#allocation17_spill]] %s3175_s8  ;;  %s155_s14 = sshll.u32 %s2394_s13, 4  ;;  %s156_s14 = int_to_ptr.vmem [resolvable:$true] %s155_s14 }
  0x1e   : > { %p2082_p13 = pnand %p2081_p12, %p2483_p1  ;;  %s3157_s15 = smov 128  }
  0x1f   : > { %s3158_s16 = smov 8   ;;  %s38_s17 = sadd.s32 1, %s2383_s26 }
  0x20   : > { %s41_s18 = sadd.s32 1, %s2387_s27  ;;  %p39_p0 = scmp.ge.s32.totalorder %s38_s17, 2 }
  0x21   : > { %s48_s22 = sadd.s32 1, %s2371_s23  ;;  %p55_p2 = scmp.ne.s32.totalorder %s2371_s23, %s2367_s0 }
  0x22   : > { %s153_s12 = sshll.u32 %s3178_s2, 4  ;;  %p56_p3 = scmp.eq.s32.totalorder %s2391_s28, 0  ;;  %s154_s12 = int_to_ptr.hbm [resolvable:$true] %s153_s12 }
  0x23   : > { %2084 = dma.hbm_to_vmem [thread:$0]  (!%p2082_p13), %s154_s12, 1024, %s156_s14, [#allocation8], %s3157_s15, %s3157_s15, %s3158_s16  }
  0x24   : > { %s3201_s17 = smov (%p39_p0, %s38_s17), 0  ;;  %s3203_s18 = smov (!%p39_p0, %s41_s18), %s2387_s27 }
  0x25   : > { %3179 = sst [smem:[#allocation18_spill]] %s3201_s17  ;;  %p2530_p5 = por %p56_p3, %p55_p2 }
  0x26   : > { %s114_s30 = ssub.s32 %s2383_s26, %s3201_s17  ;;  %p43_p7 = scmp.ge.s32.totalorder %s3203_s18, 2 }
  0x27   : > { %s118_s10 = sadd.s32 1, %s2359_s21  ;;  %p2094_p8 = scmp.lt.s32.totalorder %s2391_s28, 4 }
  0x28   : > { %s172_s11 = sand.u32 1, %s2371_s23   ;;  %s3205_s18 = smov (%p43_p7, %s3203_s18), 0 }
  0x29   : > { %3181 = sst [smem:[#allocation19_spill]] %s3205_s18  ;;  %s2044_s12 = sshll.u32 %s172_s11, 6 }
  0x2a   : > { %s45_s13 = ssub.s32 %s2387_s27, %s3205_s18  ;;  %s2062_s15 = sshll.u32 %s2387_s27, 6 }
  0x2b   : > { %p46_p9 = scmp.eq.s32.totalorder %s45_s13, 0  ;;  %s115_s14 = sor.u32 %s114_s30, %s45_s13 }
  0x2c   : > { %p116_p12 = scmp.eq.s32.totalorder %s115_s14, 0  ;;  %s181_s8 = scalar_lea.hbm %s3153_s1, %s2062_s15 }
  0x2d   : > { %s2545_s16 = scalar_select %p46_p9, %s2371_s23, %s48_s22  }
  0x2e   : > { %s2548_s2 = scalar_select %p116_p12, %s2359_s21, %s118_s10  }
  0x2f   : > { %s176_s19 = scalar_lea.vmem [#allocation4], %s2044_s12  ;;  %s182_s4 = sshll.u32 %s181_s8, 4  ;;  %s183_s4 = int_to_ptr.hbm [resolvable:$true] %s182_s4 }
  0x30   : > { %s184_s7 = sshll.u32 %s176_s19, 4  ;;  %p2086_p13 = pnand %p2094_p8, %p2530_p5  ;;  %s185_s7 = int_to_ptr.vmem [resolvable:$true] %s184_s7 }
  0x31   : > { %s173_s18 = scalar_lea.sflag [#allocation5], %s172_s11  ;;  %s3182_s30 = smov 8  }
  0x32   : > { %s3183_s13 = smov 128   ;;  %196 = sbr.rel (%p2507_p11) target bundleno = 705 (0x2c1), region = 32 }
  0x33   : > { %2088 = dma.hbm_to_vmem [thread:$0]  (!%p2086_p13), %s183_s4, 1024, %s185_s7, %s173_s18, %s3183_s13, %s3183_s13, %s3182_s30  }
  0x34   : > { %s198_s26 = sand.u32 (!%p2507_p11), 1, %s2367_s0  }
  0x35   : > { %s2048_s15 = sshll.u32 (!%p2507_p11), %s198_s26, 6  ;;  %s199_s17 = scalar_lea.sflag (!%p2507_p11), [#allocation5], %s198_s26 }
  0x36   : > { %s2563_s19 = scalar_lea.vmem (!%p2507_p11), [#allocation4], %s2048_s15 }
  0x37   : > { %2338 = dma.done.wait (%p2491_p4), %s199_s17, 1024  }
  0x38   : > { %2340 = vsyncadd (%p2491_p4), %s199_s17, 4294966272 }
  0x39   : > { %2342 = dma.done.wait (%p2483_p1), [#allocation8], 1024  }
  0x3a   : > { %2344 = vsyncadd (%p2483_p1), [#allocation8], 4294966272  ;;  %v247_v0 = vld [vmem:[#allocation7 + $0x38] sm:$0xff]  ;;  %v246_v1 = vld [vmem:[#allocation7 + $0x30] sm:$0xff]  ;;  %vm248_vm0 = vcmask 523264   ;;  %s2748_s4 = sshll.u32 %s2375_s24, 9 }
  0x3b   : > { %v245_v2 = vld [vmem:[#allocation7 + $0x28] sm:$0xff]  ;;  %v2573_v3 = vand.u32 4294901760, %v247_v0  ;;  %v2575_v4 = vand.u32 4294901760, %v246_v1  ;;  %v244_v6 = vld [vmem:[#allocation7 + $0x20] sm:$0xff]  ;;  %v243_v7 = vld [vmem:[#allocation7 + $0x18] sm:$0xff]  ;;  %s2751_s5 = sadd.s32 384, %s2748_s4 }
  0x3c   : > { %v2577_v5 = vand.u32 4294901760, %v245_v2  ;;  %v242_v8 = vld [vmem:[#allocation7 + $0x10] sm:$0xff]  ;;  %v2579_v9 = vand.u32 4294901760, %v244_v6  ;;  %v2581_v10 = vand.u32 4294901760, %v243_v7  ;;  %v241_v12 = vld [vmem:[#allocation7 + $0x8] sm:$0xff]  ;;  %v240_v13 = vld [vmem:[#allocation7] sm:$0xff] }
  0x3d   : > { %v2583_v11 = vand.u32 4294901760, %v242_v8  ;;  %v232_v14 = vld [vmem:[%s2563_s19] sm:$0xff]  ;;  %282 = vmatpush.msra.mxu0 %v2573_v3  ;;  %v2588_v15 = vsub.f32 %v247_v0, %v2573_v3  ;;  %v2591_v16 = vsub.f32 %v246_v1, %v2575_v4  ;;  %533 = vmatpush.msra.mxu3 %v2573_v3  ;;  %v2597_v18 = vand.u32 4294901760, %v241_v12  ;;  %v233_v36 = vld [vmem:[%s2563_s19 + $0x8] sm:$0xff]  ;;  %v234_v37 = vld [vmem:[%s2563_s19 + $0x10] sm:$0xff]  ;;  %s1627_s6 = sld [smem:[#allocation3 + %s2751_s5]] }
  0x3e   : > { %v2595_v17 = vsub.f32 %v245_v2, %v2577_v5  ;;  %v2600_v19 = vsub.f32 %v244_v6, %v2579_v9  ;;  %v2603_v20 = vsub.f32 %v243_v7, %v2581_v10  ;;  %v2605_v21 = vand.u32 4294901760, %v240_v13  ;;  %v235_v59 = vld [vmem:[%s2563_s19 + $0x18] sm:$0xff]  ;;  %s1631_s7 = sadd.s32 1, %s2751_s5  ;;  %s1638_s9 = sadd.s32 2, %s2751_s5 }
  0x3f   : > { %v2608_v22 = vsub.f32 %v242_v8, %v2583_v11  ;;  %284 = vmatpush.msra.mxu0 %v2575_v4  ;;  %461 = vmatpush.msra.mxu2 %v2588_v15  ;;  %v372_v23 = vand.u32 4294901760, %v2588_v15  ;;  %v378_v24 = vand.u32 4294901760, %v2591_v16  ;;  %v250_v26 = vsel %vm248_vm0, %v232_v14, 0  ;;  %s1632_s8 = sld [smem:[#allocation3 + %s1631_s7]]  ;;  %s2772_s22 = sadd.s32 128, %s2748_s4 }
  0x40   : > { %v384_v25 = vand.u32 4294901760, %v2595_v17  ;;  %535 = vmatpush.msra.mxu3 %v2575_v4  ;;  %v390_v27 = vand.u32 4294901760, %v2600_v19  ;;  %v2618_v28 = vand.u32 4294901760, %v250_v26  ;;  %v396_v29 = vand.u32 4294901760, %v2603_v20  ;;  %s2767_s18 = sld [smem:[#allocation3 + %s1638_s9]]  ;;  %s2776_s29 = sadd.s32 256, %s2748_s4 }
  0x41   : > { %v2622_v30 = vsub.f32 %v241_v12, %v2597_v18  ;;  %286 = vmatpush.msra.mxu0 %v2577_v5  ;;  %464 = vmatpush.msra.mxu2 %v2591_v16  ;;  %v373_v31 = vsub.f32 %v2588_v15, %v372_v23  ;;  %v379_v32 = vsub.f32 %v2591_v16, %v378_v24  ;;  %v402_v35 = vand.u32 4294901760, %v2608_v22  ;;  %v236_v12 = vld [vmem:[%s2563_s19 + $0x20] sm:$0xff]  ;;  %s2780_s10 = sld [smem:[#allocation3 + %s2748_s4]]  ;;  %s733_s11 = sadd.s32 1, %s2748_s4 }
  0x42   : > { %v385_v33 = vsub.f32 %v2595_v17, %v384_v25  ;;  %537 = vmatpush.msra.mxu3 %v2577_v5  ;;  %v298_v34 = vsub.f32 %v250_v26, %v2618_v28  ;;  %v391_v40 = vsub.f32 %v2600_v19, %v390_v27  ;;  %v2646_v41 = vsub.f32 %v240_v13, %v2605_v21  ;;  %s2784_s12 = sld [smem:[#allocation3 + %s2772_s22]]  ;;  %s1033_s14 = sadd.s32 1, %s2772_s22 }
  0x43   : > { %288 = vmatpush.msra.mxu0 %v2579_v9  ;;  %v374_v38 = vand.u32 4294901760, %v373_v31  ;;  %467 = vmatpush.msra.mxu2 %v2595_v17  ;;  %v380_v39 = vand.u32 4294901760, %v379_v32  ;;  %v397_v43 = vsub.f32 %v2603_v20, %v396_v29  ;;  %v408_v45 = vand.u32 4294901760, %v2622_v30  ;;  %s2788_s30 = sld [smem:[#allocation3 + %s2776_s29]]  ;;  %s1332_s13 = sadd.s32 1, %s2776_s29 }
  0x44   : > { %539 = vmatpush.msra.mxu3 %v2579_v9  ;;  %v299_v42 = vand.u32 4294901760, %v298_v34  ;;  %v386_v44 = vand.u32 4294901760, %v385_v33  ;;  %v253_v46 = vsel %vm248_vm0, %v233_v36, 0  ;;  %v256_v47 = vsel %vm248_vm0, %v234_v37, 0  ;;  %s2791_s26 = sld [smem:[#allocation3 + %s733_s11]]  ;;  %s740_s15 = sadd.s32 2, %s2748_s4 }
  0x45   : > { %290 = vmatpush.msra.mxu0 %v2581_v10  ;;  %375 = vmatpush.msra.mxu1 %v374_v38  ;;  %v2658_v49 = vand.u32 4294901760, %v253_v46  ;;  %v392_v50 = vand.u32 4294901760, %v391_v40  ;;  %v403_v51 = vsub.f32 %v2608_v22, %v402_v35  ;;  %v414_v52 = vand.u32 4294901760, %v2646_v41  ;;  %s2795_s17 = sld [smem:[#allocation3 + %s1033_s14]]  ;;  %s1339_s7 = sadd.s32 2, %s2776_s29 }
  0x46   : > { %470 = vmatpush.msra.mxu2 %v2600_v19  ;;  %541 = vmatpush.msra.mxu3 %v2581_v10  ;;  %v300_v48 = vsub.f32 %v298_v34, %v299_v42  ;;  %v2668_v55 = vand.u32 4294901760, %v256_v47  ;;  %v398_v56 = vand.u32 4294901760, %v397_v43  ;;  %v409_v57 = vsub.f32 %v2622_v30, %v408_v45  ;;  %s747_s9 = sadd.s32 3, %s2748_s4  ;;  %s1346_s11 = sadd.s32 3, %s2776_s29 }
  0x47   : > { %292 = vmatpush.msra.mxu0 %v2583_v11  ;;  %381 = vmatpush.msra.mxu1 %v380_v39  ;;  %v306_v54 = vsub.f32 %v253_v46, %v2658_v49  ;;  %v404_v60 = vand.u32 4294901760, %v403_v51  ;;  %v415_v61 = vsub.f32 %v2646_v41, %v414_v52  ;;  %v259_v1 = vsel %vm248_vm0, %v235_v59, 0  ;;  %s2812_s14 = sld [smem:[#allocation3 + %s1339_s7]]  ;;  %s1047_s7 = sadd.s32 3, %s2772_s22 }
  0x48   : > { %473 = vmatpush.msra.mxu2 %v2603_v20  ;;  %v301_v53 = vand.u32 4294901760, %v300_v48  ;;  %543 = vmatpush.msra.mxu3 %v2583_v11  ;;  %v314_v63 = vsub.f32 %v256_v47, %v2668_v55  ;;  %v410_v0 = vand.u32 4294901760, %v409_v57  ;;  %v2686_v8 = vand.u32 4294901760, %v259_v1  ;;  %s2821_s4 = sld [smem:[#allocation3 + %s1346_s11]]  ;;  %s2057_s11 = sshll.u32 %s2375_s24, 4 }
  0x49   : > { %294 = vmatpush.msra.mxu0 %v2597_v18  ;;  %387 = vmatpush.msra.mxu1 %v386_v44  ;;  %v307_v58 = vand.u32 4294901760, %v306_v54  ;;  %v416_v2 = vand.u32 4294901760, %v415_v61  ;;  %v262_v26 = vsel %vm248_vm0, %v236_v12, 0  ;;  %vm758_vm1 = vcmask 130048  }
  0x4a   : > { %476 = vmatpush.msra.mxu2 %v2608_v22  ;;  %545 = vmatpush.msra.mxu3 %v2597_v18  ;;  %v315_v7 = vand.u32 4294901760, %v314_v63  ;;  %v322_v14 = vsub.f32 %v259_v1, %v2686_v8  ;;  %v238_v22 = vld [vmem:[%s2563_s19 + $0x30] sm:$0xff] }
  0x4b   : > { %296 = vmatpush.msra.mxu0 %v2605_v21  ;;  %393 = vmatpush.msra.mxu1 %v392_v50  ;;  %v308_v62 = vsub.f32 %v306_v54, %v307_v58 }
  0x4c   : > { %302 = vmatmul.f32.vlgmr.msra.gmra.mxu0 %v301_v53  ;;  %479 = vmatpush.msra.mxu2 %v2622_v30  ;;  %v316_v13 = vsub.f32 %v314_v63, %v315_v7  ;;  %v323_v16 = vand.u32 4294901760, %v322_v14 }
  0x4d   : > { %399 = vmatpush.msra.mxu1 %v398_v56  ;;  %547 = vmatpush.msra.mxu3 %v2605_v21  ;;  %v309_v6 = vand.u32 4294901760, %v308_v62 }
  0x4e   : > { %482 = vmatpush.msra.mxu2 %v2646_v41  ;;  %551 = vmatmul.f32.vlgmr.msra.gmra.mxu3 %v299_v42  ;;  %v317_v15 = vand.u32 4294901760, %v316_v13  ;;  %v1628_v13 = vstv %s1627_s6  ;;  %s2800_s6 = sld [smem:[#allocation3 + %s1332_s13]]  ;;  %s1645_s13 = sadd.s32 3, %s2751_s5 }
  0x4f   : > { %405 = vmatpush.msra.mxu1 %v404_v60  ;;  %485 = vmatmul.f32.vlgmr.msra.gmra.mxu2 %v298_v34  ;;  %s2826_s5 = sld [smem:[#allocation3 + %s1645_s13]] }
  0x50   : > { %608 = vmatpush.msrb.mxu0 %v372_v23  ;;  %v2701_v23 = vand.u32 4294901760, %v262_v26 }
  0x51   : > { %411 = vmatpush.msra.mxu1 %v410_v0 }
  0x52   : > { %612 = vmatpush.msrb.mxu0 %v378_v24  ;;  %v237_v24 = vld [vmem:[%s2563_s19 + $0x28] sm:$0xff]  ;;  %v330_v17 = vsub.f32 %v262_v26, %v2701_v23 }
  0x53   : > { %417 = vmatpush.msra.mxu1 %v416_v2  ;;  %v265_v19 = vsel %vm248_vm0, %v237_v24, 0 }
  0x54   : > { %310 = vmatmul.f32.gmra.mxu0 %v309_v6  ;;  %419 = vmatmul.f32.vlgmr.msra.gmra.mxu1 %v2618_v28  ;;  %v337_v20 = vand.u32 4294901760, %v265_v19 }
  0x55   : > { %616 = vmatpush.msrb.mxu0 %v384_v25  ;;  %679 = vmatpush.msrb.mxu1 %v2573_v3  ;;  %v324_v3 = vsub.f32 %v322_v14, %v323_v16 }
  0x56   : > { %557 = vmatmul.f32.gmra.mxu3 %v307_v58 }
  0x57   : > { %490 = vmatmul.f32.gmra.mxu2 %v306_v54  ;;  %620 = vmatpush.msrb.mxu0 %v390_v27  ;;  %v338_v27 = vsub.f32 %v265_v19, %v337_v20 }
  0x58   : > { %681 = vmatpush.msrb.mxu1 %v2575_v4  ;;  %v325_v4 = vand.u32 4294901760, %v324_v3 }
  0x59   : > { %624 = vmatpush.msrb.mxu0 %v396_v29  ;;  %v339_v30 = vand.u32 4294901760, %v338_v27 }
  0x5a   : > { %683 = vmatpush.msrb.mxu1 %v2577_v5  ;;  %v331_v5 = vand.u32 4294901760, %v330_v17 }
  0x5b   : > { %628 = vmatpush.msrb.mxu0 %v402_v35 }
  0x5c   : > { %318 = vmatmul.f32.gmra.mxu0 %v317_v15  ;;  %423 = vmatmul.f32.gmra.mxu1 %v2658_v49  ;;  %v332_v25 = vsub.f32 %v330_v17, %v331_v5 }
  0x5d   : > { %632 = vmatpush.msrb.mxu0 %v408_v45  ;;  %685 = vmatpush.msrb.mxu1 %v2579_v9  ;;  %v268_v9 = vsel %vm248_vm0, %v238_v22, 0 }
  0x5e   : > { %563 = vmatmul.f32.gmra.mxu3 %v315_v7  ;;  %v333_v29 = vand.u32 4294901760, %v332_v25  ;;  %v345_v31 = vand.u32 4294901760, %v268_v9 }
  0x5f   : > { %495 = vmatmul.f32.gmra.mxu2 %v314_v63  ;;  %636 = vmatpush.msrb.mxu0 %v414_v52 }
  0x60   : > { %687 = vmatpush.msrb.mxu1 %v2581_v10  ;;  %v239_v10 = vld [vmem:[%s2563_s19 + $0x38] sm:$0xff]  ;;  %v346_v32 = vsub.f32 %v268_v9, %v345_v31  ;;  %s1040_s19 = sadd.s32 2, %s2772_s22  ;;  %s2849_s22 = sld [smem:[#allocation3 + %s1047_s7]] }
  0x61   : > { %v271_v33 = vsel %vm248_vm0, %v239_v10, 0  ;;  %v1633_v10 = vstv %s1632_s8  ;;  %s2803_s8 = sld [smem:[#allocation3 + %s740_s15]] }
  0x62   : > { %689 = vmatpush.msrb.mxu1 %v2583_v11  ;;  %v340_v11 = vsub.f32 %v338_v27, %v339_v30  ;;  %v347_v35 = vand.u32 4294901760, %v346_v32  ;;  %s2819_s15 = sld [smem:[#allocation3 + %s747_s9]] }
  0x64   : > { %326 = vmatmul.f32.gmra.mxu0 %v325_v4  ;;  %427 = vmatmul.f32.gmra.mxu1 %v2668_v55  ;;  %v341_v34 = vand.u32 4294901760, %v340_v11 }
  0x65   : > { %691 = vmatpush.msrb.mxu1 %v2597_v18  ;;  %v353_v18 = vand.u32 4294901760, %v271_v33 }
  0x66   : > { %569 = vmatmul.f32.gmra.mxu3 %v323_v16 }
  0x67   : > { %500 = vmatmul.f32.gmra.mxu2 %v322_v14  ;;  %693 = vmatpush.msrb.mxu1 %v2605_v21  ;;  %v348_v21 = vsub.f32 %v346_v32, %v347_v35  ;;  %v354_v36 = vsub.f32 %v271_v33, %v353_v18 }
  0x69   : > { %v349_v37 = vand.u32 4294901760, %v348_v21  ;;  %v355_v38 = vand.u32 4294901760, %v354_v36 }
  0x6b   : > { %v356_v39 = vsub.f32 %v354_v36, %v355_v38 }
  0x6c   : > { %334 = vmatmul.f32.gmra.mxu0 %v333_v29  ;;  %431 = vmatmul.f32.gmra.mxu1 %v2686_v8 }
  0x6d   : > { %v357_v40 = vand.u32 4294901760, %v356_v39 }
  0x6e   : > { %575 = vmatmul.f32.gmra.mxu3 %v331_v5 }
  0x6f   : > { %505 = vmatmul.f32.gmra.mxu2 %v330_v17 }
  0x74   : > { %342 = vmatmul.f32.gmra.mxu0 %v341_v34  ;;  %435 = vmatmul.f32.gmra.mxu1 %v2701_v23 }
  0x76   : > { %581 = vmatmul.f32.gmra.mxu3 %v339_v30 }
  0x77   : > { %510 = vmatmul.f32.gmra.mxu2 %v338_v27 }
  0x7c   : > { %350 = vmatmul.f32.gmra.mxu0 %v349_v37  ;;  %439 = vmatmul.f32.gmra.mxu1 %v337_v20 }
  0x7e   : > { %587 = vmatmul.f32.gmra.mxu3 %v347_v35 }
  0x7f   : > { %515 = vmatmul.f32.gmra.mxu2 %v346_v32 }
  0x84   : > { %358 = vmatmul.f32.gmra.mxu0 %v357_v40  ;;  %443 = vmatmul.f32.gmra.mxu1 %v345_v31 }
  0x86   : > { %593 = vmatmul.f32.gmra.mxu3 %v355_v38 }
  0x87   : > { %520 = vmatmul.f32.gmra.mxu2 %v354_v36 }
  0x8c   : > { %447 = vmatmul.f32.gmra.mxu1 %v353_v18  ;;  %638 = vmatmul.f32.vlgmr.msrb.gmra.mxu0 %v2618_v28 }
  0x94   : > { %642 = vmatmul.f32.gmra.mxu0 %v2658_v49  ;;  %695 = vmatmul.f32.vlgmr.msrb.gmra.mxu1 %v2618_v28 }
  0x9c   : > { %646 = vmatmul.f32.gmra.mxu0 %v2668_v55  ;;  %699 = vmatmul.f32.gmra.mxu1 %v2658_v49 }
  0xa4   : > { %650 = vmatmul.f32.gmra.mxu0 %v2686_v8  ;;  %703 = vmatmul.f32.gmra.mxu1 %v2668_v55 }
  0xac   : > { %654 = vmatmul.f32.gmra.mxu0 %v2701_v23  ;;  %707 = vmatmul.f32.gmra.mxu1 %v2686_v8 }
  0xb4   : > { %658 = vmatmul.f32.gmra.mxu0 %v337_v20  ;;  %711 = vmatmul.f32.gmra.mxu1 %v2701_v23 }
  0xbc   : > { %662 = vmatmul.f32.gmra.mxu0 %v345_v31  ;;  %715 = vmatmul.f32.gmra.mxu1 %v337_v20 }
  0xc4   : > { %666 = vmatmul.f32.gmra.mxu0 %v353_v18  ;;  %719 = vmatmul.f32.gmra.mxu1 %v345_v31 }
  0xc9   : > { %v303_v28 = vpop.f32.mrf.mxu0 }
  0xcc   : > { %723 = vmatmul.f32.gmra.mxu1 %v353_v18 }
  0xd1   : > { %v311_v41 = vpop.f32.mrf.mxu0  ;;  %v420_v42 = vpop.f32.mrf.mxu1 }
  0xd2   : > { %v486_v51 = vpop.f32.mrf.mxu2  ;;  %v552_v52 = vpop.f32.mrf.mxu3  ;;  %v421_v59 = vadd.f32 %v420_v42, %v303_v28 }
  0xd4   : > { %v487_v63 = vadd.f32 %v486_v51, %v421_v59 }
  0xd6   : > { %v553_v1 = vadd.f32 %v552_v52, %v487_v63 }
  0xd9   : > { %v319_v43 = vpop.f32.mrf.mxu0  ;;  %v424_v44 = vpop.f32.mrf.mxu1 }
  0xda   : > { %v491_v55 = vpop.f32.mrf.mxu2  ;;  %v558_v56 = vpop.f32.mrf.mxu3  ;;  %v425_v2 = vadd.f32 %v424_v44, %v311_v41 }
  0xdc   : > { %v492_v14 = vadd.f32 %v491_v55, %v425_v2 }
  0xde   : > { %v559_v23 = vadd.f32 %v558_v56, %v492_v14 }
  0xe1   : > { %v327_v45 = vpop.f32.mrf.mxu0  ;;  %v428_v46 = vpop.f32.mrf.mxu1 }
  0xe2   : > { %v496_v60 = vpop.f32.mrf.mxu2  ;;  %v564_v0 = vpop.f32.mrf.mxu3  ;;  %v429_v24 = vadd.f32 %v428_v46, %v319_v43 }
  0xe4   : > { %v497_v4 = vadd.f32 %v496_v60, %v429_v24  ;;  %v742_v24 = vstv %s2803_s8  ;;  %s228_s8 = sand.u32 1, %s2355_s20  }
  0xe5   : > { %s2050_s9 = sshll.u32 %s228_s8, 7 }
  0xe6   : > { %v565_v25 = vadd.f32 %v564_v0, %v497_v4 }
  0xe9   : > { %v335_v47 = vpop.f32.mrf.mxu0  ;;  %v432_v48 = vpop.f32.mrf.mxu1 }
  0xea   : > { %v501_v6 = vpop.f32.mrf.mxu2  ;;  %v570_v15 = vpop.f32.mrf.mxu3  ;;  %v433_v27 = vadd.f32 %v432_v48, %v327_v45 }
  0xec   : > { %v502_v11 = vadd.f32 %v501_v6, %v433_v27 }
  0xee   : > { %v571_v35 = vadd.f32 %v570_v15, %v502_v11 }
  0xf1   : > { %v2739_v49 = vpop.f32.mrf.mxu0  ;;  %v436_v50 = vpop.f32.mrf.mxu1 }
  0xf2   : > { %v506_v5 = vpop.f32.mrf.mxu2  ;;  %v576_v9 = vpop.f32.mrf.mxu3  ;;  %v437_v18 = vadd.f32 %v436_v50, %v335_v47 }
  0xf4   : > { %v507_v40 = vadd.f32 %v506_v5, %v437_v18 }
  0xf6   : > { %v577_v42 = vadd.f32 %v576_v9, %v507_v40 }
  0xf9   : > { %v2741_v53 = vpop.f32.mrf.mxu0  ;;  %v440_v54 = vpop.f32.mrf.mxu1 }
  0xfa   : > { %v511_v33 = vpop.f32.mrf.mxu2  ;;  %v582_v36 = vpop.f32.mrf.mxu3  ;;  %v441_v43 = vadd.f32 %v440_v54, %v2739_v49  ;;  %v1640_v49 = vstv %s2767_s18  ;;  %s2809_s18 = sld [smem:[#allocation3 + %s1040_s19]] }
  0xfb   : > { %s3184_s19 = sld [smem:[#allocation21_spill]] }
  0xfc   : > { %v512_v50 = vadd.f32 %v511_v33, %v441_v43  ;;  %v749_v33 = vstv %s2819_s15 }
  0xfe   : > { %v583_v56 = vadd.f32 %v582_v36, %v512_v50 }
 0x100   : > { %v1042_v27 = vstv %s2809_s18  ;;  %s3068_s18 = scalar_lea.vmem [#allocation9], %s2050_s9 }
 0x101   : > { %v2743_v57 = vpop.f32.mrf.mxu0  ;;  %v2745_v58 = vpop.f32.mrf.mxu1  ;;  %s1939_s7 = sshll.u32 %s3068_s18, 4  ;;  %s1940_s7 = int_to_ptr.vmem [resolvable:$true] %s1939_s7 }
 0x102   : > { %v516_v44 = vpop.f32.mrf.mxu2  ;;  %v588_v51 = vpop.f32.mrf.mxu3  ;;  %v445_v55 = vadd.f32 %v2745_v58, %v2741_v53  ;;  %v754_v58 = vld [vmem:[%s3155_s3] sm:$0xff] }
 0x103   : > { %v760_v6 = vsel %vm758_vm1, %v754_v58, 0 }
 0x104   : > { %v517_v63 = vadd.f32 %v516_v44, %v445_v55  ;;  %v2841_v4 = vand.u32 4294901760, %v760_v6 }
 0x106   : > { %v589_v15 = vadd.f32 %v588_v51, %v517_v63 }
 0x109   : > { %v2753_v61 = vpop.f32.mrf.mxu1  ;;  %v639_v62 = vpop.f32.mrf.mxu0 }
 0x10a   : > { %v640_v7 = vadd.f32 %v639_v62, %v553_v1  ;;  %v449_v60 = vadd.f32 %v2753_v61, %v2743_v57  ;;  %v521_v62 = vpop.f32.mrf.mxu2  ;;  %v735_v1 = vstv %s2791_s26 }
 0x10c   : > { %v522_v61 = vadd.f32 %v521_v62, %v449_v60 }
 0x111   : > { %v643_v8 = vpop.f32.mrf.mxu0  ;;  %v696_v12 = vpop.f32.mrf.mxu1 }
 0x112   : > { %v2756_v26 = vadd.f32 %v696_v12, %v640_v7  ;;  %v644_v3 = vadd.f32 %v643_v8, %v559_v23  ;;  %v594_v7 = vpop.f32.mrf.mxu3  ;;  %v730_v8 = vstv %s2780_s10  ;;  %v1030_v12 = vstv %s2784_s12  ;;  %s1925_s10 = scalar_lea.sflag [#allocation6], %s228_s8 }
 0x113   : > { %v1035_v23 = vstv %s2795_s17  ;;  %v595_v5 = vadd.f32 %v594_v7, %v522_v61 }
 0x114   : > { %v1629_v16 = vmul.f32 %v1628_v13, %v2756_v26  ;;  %v1031_v9 = vmul.f32 %v1030_v12, %v2756_v26 }
 0x119   : > { %v647_v17 = vpop.f32.mrf.mxu0  ;;  %v700_v19 = vpop.f32.mrf.mxu1 }
 0x11a   : > { %v2760_v20 = vadd.f32 %v700_v19, %v644_v3  ;;  %v648_v29 = vadd.f32 %v647_v17, %v565_v25  ;;  %v1341_v17 = vstv %s2812_s14  ;;  %s2058_s14 = sshll.u32 %s2379_s25, 5 }
 0x11b   : > { %s1936_s13 = sadd.s32 %s2058_s14, %s2057_s11 }
 0x11c   : > { %v1630_v22 = vmul.f32 %v1628_v13, %v2760_v20  ;;  %v1334_v13 = vstv %s2800_s6  ;;  %v732_v18 = vmul.f32 %v730_v8, %v2760_v20  ;;  %s2059_s15 = sshll.u32 %s1936_s13, 3 }
 0x11d   : > { %s1938_s24 = scalar_lea.hbm %s3184_s19, %s2059_s15 }
 0x121   : > { %v651_v30 = vpop.f32.mrf.mxu0  ;;  %v704_v31 = vpop.f32.mrf.mxu1 }
 0x122   : > { %v2763_v32 = vadd.f32 %v704_v31, %v648_v29  ;;  %v652_v37 = vadd.f32 %v651_v30, %v571_v35  ;;  %v1647_v35 = vstv %s2826_s5  ;;  %s3185_s5 = smov %s3184_s19 }
 0x123   : > { %s2283_s6 = scalar_lea.hbm %s3185_s5, 512 }
 0x124   : > { %v1634_v34 = vmul.f32 %v1633_v10, %v2763_v32  ;;  %v736_v3 = vmul.f32 %v735_v1, %v2763_v32  ;;  %v1335_v25 = vmul.f32 %v1334_v13, %v2763_v32 }
 0x126   : > { %v1636_v21 = vadd.f32 %v1634_v34, %v1629_v16  ;;  %v1329_v16 = vstv %s2788_s30  ;;  %v1348_v34 = vstv %s2821_s4 }
 0x127   : > { %v1330_v29 = vmul.f32 %v1329_v16, %v2756_v26 }
 0x129   : > { %v655_v38 = vpop.f32.mrf.mxu0  ;;  %v708_v39 = vpop.f32.mrf.mxu1 }
 0x12a   : > { %v2769_v28 = vadd.f32 %v708_v39, %v652_v37  ;;  %v656_v46 = vadd.f32 %v655_v38, %v577_v42  ;;  %v2857_v37 = vsub.f32 %v760_v6, %v2841_v4  ;;  %v1337_v38 = vadd.f32 %v1335_v25, %v1330_v29 }
 0x12c   : > { %v1635_v41 = vmul.f32 %v1633_v10, %v2769_v28  ;;  %v737_v39 = vmul.f32 %v735_v1, %v2769_v28  ;;  %v1037_v40 = vmul.f32 %v1035_v23, %v2769_v28  ;;  %v2869_v55 = vand.u32 4294901760, %v2857_v37 }
 0x12e   : > { %v1637_v45 = vadd.f32 %v1635_v41, %v1630_v22  ;;  %v731_v22 = vmul.f32 %v730_v8, %v2756_v26  ;;  %v1032_v26 = vmul.f32 %v1030_v12, %v2760_v20  ;;  %v755_v41 = vld [vmem:[%s3155_s3 + $0x8] sm:$0xff] }
 0x130   : > { %v1039_v63 = vadd.f32 %v1037_v40, %v1032_v26 }
 0x131   : > { %v659_v47 = vpop.f32.mrf.mxu0  ;;  %v712_v48 = vpop.f32.mrf.mxu1 }
 0x132   : > { %v2797_v52 = vadd.f32 %v712_v48, %v656_v46  ;;  %v660_v53 = vadd.f32 %v659_v47, %v583_v56  ;;  %v1331_v46 = vmul.f32 %v1329_v16, %v2760_v20  ;;  %v1036_v47 = vmul.f32 %v1035_v23, %v2763_v32 }
 0x133   : > { %v1336_v48 = vmul.f32 %v1334_v13, %v2769_v28  ;;  %v763_v56 = vsel %vm758_vm1, %v755_v41, 0  ;;  %v739_v20 = vadd.f32 %v737_v39, %v732_v18  ;;  %v757_v39 = vld [vmem:[%s3155_s3 + $0x18] sm:$0xff] }
 0x134   : > { %v1641_v54 = vmul.f32 %v1640_v49, %v2797_v52  ;;  %v743_v30 = vmul.f32 %v742_v24, %v2797_v52  ;;  %v1342_v10 = vmul.f32 %v1341_v17, %v2797_v52  ;;  %v1043_v61 = vmul.f32 %v1042_v27, %v2797_v52 }
 0x135   : > { %v1338_v28 = vadd.f32 %v1336_v48, %v1331_v46  ;;  %v2879_v6 = vand.u32 4294901760, %v763_v56  ;;  %v1038_v7 = vadd.f32 %v1036_v47, %v1031_v9 }
 0x136   : > { %v2814_v59 = vadd.f32 %v1641_v54, %v1636_v21  ;;  %v738_v21 = vadd.f32 %v736_v3, %v731_v22 }
 0x137   : > { %v2890_v22 = vsub.f32 %v763_v56, %v2879_v6 }
 0x138   : > { %v745_v42 = vadd.f32 %v743_v30, %v738_v21 }
 0x139   : > { %v716_v0 = vpop.f32.mrf.mxu1  ;;  %v663_v2 = vpop.f32.mrf.mxu0  ;;  %v2906_v18 = vand.u32 4294901760, %v2890_v22 }
 0x13a   : > { %v717_v57 = vadd.f32 %v716_v0, %v660_v53  ;;  %v664_v31 = vadd.f32 %v663_v2, %v589_v15  ;;  %v1049_v0 = vstv %s2849_s22  ;;  %s1941_s22 = sshll.u32 %s1938_s24, 4  ;;  %s1942_s22 = int_to_ptr.hbm [resolvable:$true] %s1941_s22 }
 0x13b   : > { %s2277_s12 = sshra.s32 %s1942_s22, 4  ;;  %s2278_s12 = int_to_ptr.hbm [resolvable:$true] %s2277_s12 }
 0x13c   : > { %v1642_v14 = vmul.f32 %v1640_v49, %v717_v57  ;;  %v1344_v49 = vadd.f32 %v1342_v10, %v1337_v38  ;;  %v744_v51 = vmul.f32 %v742_v24, %v717_v57  ;;  %v1044_v60 = vmul.f32 %v1042_v27, %v717_v57  ;;  %s2279_s30 = scalar_lea.hbm %s2278_s12, 128  ;;  %p2284_p0 = scmp.lt.s32.totalorder %s2278_s12, %s3185_s5 }
 0x13d   : > { %v1343_v62 = vmul.f32 %v1341_v17, %v717_v57  ;;  %v792_v57 = vsub.f32 %v2857_v37, %v2869_v55  ;;  %v1045_v17 = vadd.f32 %v1043_v61, %v1038_v7  ;;  %p2280_p1 = scmp.ne.s32.totalorder %s2278_s12, %s2279_s30  ;;  %p2285_p2 = scmp.lt.s32.totalorder %s2283_s6, %s2279_s30 }
 0x13e   : > { %v2839_v19 = vadd.f32 %v1642_v14, %v1637_v45  ;;  %v746_v8 = vadd.f32 %v744_v51, %v739_v20  ;;  %v1046_v13 = vadd.f32 %v1044_v60, %v1039_v63 }
 0x13f   : > { %v1345_v14 = vadd.f32 %v1343_v62, %v1338_v28  ;;  %p2281_p4 = pnand %p2280_p1, %p2497_p6  ;;  %p2286_p3 = por %p2285_p2, %p2284_p0 }
 0x141   : > { %v720_v11 = vpop.f32.mrf.mxu1  ;;  %v667_v50 = vpop.f32.mrf.mxu0  ;;  %p2282_p11 = pneg %p2281_p4 }
 0x142   : > { %v721_v36 = vadd.f32 %v720_v11, %v664_v31  ;;  %v668_v32 = vadd.f32 %v667_v50, %v595_v5 }
 0x143   : > { %p2287_p5 = pnand %p2286_p3, %p2282_p11 }
 0x144   : > { %v750_v43 = vmul.f32 %v749_v33, %v721_v36  ;;  %v1349_v44 = vmul.f32 %v1348_v34, %v721_v36  ;;  %v1648_v45 = vmul.f32 %v1647_v35, %v721_v36  ;;  %v1050_v15 = vmul.f32 %v1049_v0, %v721_v36 }
 0x146   : > { %v752_v54 = vadd.f32 %v750_v43, %v745_v42  ;;  %v1351_v53 = vadd.f32 %v1349_v44, %v1344_v49  ;;  %v2873_v58 = vadd.f32 %v1648_v45, %v2814_v59  ;;  %v756_v59 = vld [vmem:[%s3155_s3 + $0x10] sm:$0xff]  ;;  %v1052_v31 = vadd.f32 %v1050_v15, %v1045_v17 }
 0x147   : > { %v766_v25 = vsel %vm758_vm1, %v756_v59, 0  ;;  %v800_v44 = vsub.f32 %v2890_v22, %v2906_v18  ;;  %v769_v49 = vsel %vm758_vm1, %v757_v39, 0 }
 0x148   : > { %v2877_v2 = vand.u32 4294901760, %v752_v54  ;;  %v2886_v16 = vand.u32 4294901760, %v1351_v53  ;;  %v2908_v21 = vand.u32 4294901760, %v766_v25  ;;  %v2913_v38 = vand.u32 4294901760, %v1052_v31 }
 0x149   : > { %v724_v1 = vpop.f32.mrf.mxu1  ;;  %v2941_v60 = vand.u32 4294901760, %v800_v44  ;;  %v2946_v20 = vand.u32 4294901760, %v769_v49  ;;  %v1684_v15 = vand.u32 4294901760, %v2873_v58 }
 0x14a   : > { %v725_v12 = vadd.f32 %v724_v1, %v668_v32  ;;  %v843_v5 = vsub.f32 %v752_v54, %v2877_v2  ;;  %v2928_v45 = vsub.f32 %v766_v25, %v2908_v21  ;;  %v1142_v50 = vsub.f32 %v1052_v31, %v2913_v38 }
 0x14b   : > { %v2954_v1 = vsub.f32 %v769_v49, %v2946_v20 }
 0x14c   : > { %v751_v52 = vmul.f32 %v749_v33, %v725_v12  ;;  %v1051_v23 = vmul.f32 %v1049_v0, %v725_v12  ;;  %v1350_v24 = vmul.f32 %v1348_v34, %v725_v12  ;;  %v1649_v3 = vmul.f32 %v1647_v35, %v725_v12 }
 0x14d   : > { %v2899_v33 = vsub.f32 %v1351_v53, %v2886_v16  ;;  %v2901_v34 = vand.u32 4294901760, %v792_v57  ;;  %v844_v36 = vand.u32 4294901760, %v843_v5  ;;  %v2944_v53 = vand.u32 4294901760, %v2928_v45 }
 0x14e   : > { %v1352_v27 = vadd.f32 %v1350_v24, %v1345_v14  ;;  %v753_v9 = vadd.f32 %v751_v52, %v746_v8  ;;  %v1053_v29 = vadd.f32 %v1051_v23, %v1046_v13  ;;  %v2894_v30 = vadd.f32 %v1649_v3, %v2839_v19 }
 0x14f   : > { %v1442_v42 = vand.u32 4294901760, %v2899_v33  ;;  %v845_v48 = vsub.f32 %v843_v5, %v844_v36  ;;  %v1143_v32 = vand.u32 4294901760, %v1142_v50  ;;  %v808_v61 = vsub.f32 %v2928_v45, %v2944_v53 }
 0x150   : > { %v2896_v10 = vand.u32 4294901760, %v1352_v27  ;;  %v785_v11 = vand.u32 4294901760, %v753_v9  ;;  %v2903_v35 = vand.u32 4294901760, %v1053_v29  ;;  %v2963_v57 = vand.u32 4294901760, %v2954_v1 }
 0x151   : > { %v1443_v56 = vsub.f32 %v2899_v33, %v1442_v42  ;;  %v846_v63 = vand.u32 4294901760, %v845_v48  ;;  %v1144_v7 = vsub.f32 %v1142_v50, %v1143_v32  ;;  %v2960_v12 = vand.u32 4294901760, %v808_v61 }
 0x152   : > { %786 = vmatpush.msrb.mxu2 %v785_v11  ;;  %1003 = vmatpush.msra.mxu1 %v785_v11  ;;  %v837_v19 = vsub.f32 %v753_v9, %v785_v11  ;;  %v2911_v26 = vsub.f32 %v1352_v27, %v2896_v10  ;;  %v1136_v43 = vsub.f32 %v1053_v29, %v2903_v35 }
 0x153   : > { %v1444_v0 = vand.u32 4294901760, %v1443_v56  ;;  %v1145_v59 = vand.u32 4294901760, %v1144_v7  ;;  %v816_v13 = vsub.f32 %v2954_v1, %v2963_v57  ;;  %v1740_v23 = vsub.f32 %v2873_v58, %v1684_v15 }
 0x154   : > { %788 = vmatpush.msrb.mxu2 %v2877_v2  ;;  %1005 = vmatpush.msra.mxu1 %v2877_v2  ;;  %v838_v40 = vand.u32 4294901760, %v837_v19  ;;  %v1436_v41 = vand.u32 4294901760, %v2911_v26  ;;  %v1137_v62 = vand.u32 4294901760, %v1136_v43 }
 0x155   : > { %794 = vmatmul.f32.vlgmr.msrb.gmra.mxu2 %v2901_v34  ;;  %1007 = vmatmul.f32.vlgmr.msra.gmra.mxu1 %v2841_v4  ;;  %v2972_v14 = vand.u32 4294901760, %v816_v13 }
 0x156   : > { %881 = vmatpush.msra.mxu2 %v837_v19  ;;  %1220 = vmatpush.msrb.mxu1 %v2903_v35  ;;  %v839_v46 = vsub.f32 %v837_v19, %v838_v40  ;;  %v1437_v47 = vsub.f32 %v2911_v26, %v1436_v41  ;;  %v1138_v28 = vsub.f32 %v1136_v43, %v1137_v62 }
 0x157   : > { %966 = vmatpush.msra.mxu0 %v838_v40 }
 0x158   : > { %884 = vmatpush.msra.mxu2 %v843_v5  ;;  %1222 = vmatpush.msrb.mxu1 %v2913_v38  ;;  %v840_v51 = vand.u32 4294901760, %v839_v46  ;;  %v1438_v54 = vand.u32 4294901760, %v1437_v47  ;;  %v1139_v8 = vand.u32 4294901760, %v1138_v28 }
 0x159   : > { %970 = vmatpush.msra.mxu0 %v844_v36 }
 0x15a   : > { %1085 = vmatpush.msrb.mxu2 %v2903_v35  ;;  %972 = vmatmul.f32.vlgmr.msra.gmra.mxu0 %v2841_v4 }
 0x15b   : > { %841 = vmatpush.msrb.mxu3 %v840_v51  ;;  %1180 = vmatpush.msrb.mxu0 %v1136_v43 }
 0x15c   : > { %1087 = vmatpush.msrb.mxu2 %v2913_v38  ;;  %1439 = vmatpush.msra.mxu1 %v1438_v54 }
 0x15d   : > { %847 = vmatpush.msrb.mxu3 %v846_v63  ;;  %1183 = vmatpush.msrb.mxu0 %v1142_v50 }
 0x15e   : > { %802 = vmatmul.f32.gmra.mxu2 %v2941_v60  ;;  %1445 = vmatpush.msra.mxu1 %v1444_v0 }
 0x15f   : > { %1384 = vmatpush.msra.mxu0 %v2896_v10  ;;  %849 = vmatmul.f32.vlgmr.msrb.gmra.mxu3 %v2841_v4 }
 0x160   : > { %1011 = vmatmul.f32.gmra.mxu1 %v2879_v6  ;;  %921 = vmatpush.msra.mxu3 %v785_v11 }
 0x161   : > { %1386 = vmatpush.msra.mxu0 %v2886_v16 }
 0x162   : > { %923 = vmatpush.msra.mxu3 %v2877_v2  ;;  %976 = vmatmul.f32.gmra.mxu0 %v2879_v6  ;;  %v1682_v2 = vand.u32 4294901760, %v2894_v30 }
 0x164   : > { %1140 = vmatpush.msrb.mxu3 %v1139_v8  ;;  %v1734_v52 = vsub.f32 %v2894_v30, %v1682_v2 }
 0x166   : > { %1146 = vmatpush.msrb.mxu3 %v1145_v59  ;;  %810 = vmatmul.f32.gmra.mxu2 %v2960_v12  ;;  %v1735_v58 = vand.u32 4294901760, %v1734_v52 }
 0x167   : > { %853 = vmatmul.f32.gmra.mxu3 %v2879_v6 }
 0x168   : > { %1015 = vmatmul.f32.gmra.mxu1 %v2908_v21  ;;  %v1736_v24 = vsub.f32 %v1734_v52, %v1735_v58 }
 0x16a   : > { %980 = vmatmul.f32.gmra.mxu0 %v2908_v21  ;;  %v1737_v17 = vand.u32 4294901760, %v1736_v24 }
 0x16e   : > { %818 = vmatmul.f32.gmra.mxu2 %v2972_v14 }
 0x16f   : > { %857 = vmatmul.f32.gmra.mxu3 %v2908_v21 }
 0x170   : > { %1019 = vmatmul.f32.gmra.mxu1 %v2946_v20 }
 0x172   : > { %984 = vmatmul.f32.gmra.mxu0 %v2946_v20 }
 0x176   : > { %887 = vmatmul.f32.vlgmr.msra.gmra.mxu2 %v2857_v37 }
 0x177   : > { %1265 = vmatpush.msra.mxu2 %v1137_v62  ;;  %861 = vmatmul.f32.gmra.mxu3 %v2946_v20 }
 0x178   : > { %1226 = vmatmul.f32.vlgmr.msrb.gmra.mxu1 %v2869_v55 }
 0x179   : > { %1601 = vmatpush.msrb.mxu1 %v2896_v10  ;;  %1269 = vmatpush.msra.mxu2 %v1143_v32 }
 0x17a   : > { %1186 = vmatmul.f32.vlgmr.msrb.gmra.mxu0 %v2857_v37 }
 0x17b   : > { %1603 = vmatpush.msrb.mxu1 %v2886_v16  ;;  %1564 = vmatpush.msrb.mxu0 %v1436_v41 }
 0x17d   : > { %1568 = vmatpush.msrb.mxu0 %v1442_v42 }
 0x17e   : > { %892 = vmatmul.f32.gmra.mxu2 %v2890_v22 }
 0x17f   : > { %927 = vmatmul.f32.vlgmr.msra.gmra.mxu3 %v2869_v55 }
 0x180   : > { %1232 = vmatmul.f32.gmra.mxu1 %v2906_v18  ;;  %1302 = vmatpush.msra.mxu3 %v2903_v35 }
 0x182   : > { %1304 = vmatpush.msra.mxu3 %v2913_v38  ;;  %1191 = vmatmul.f32.gmra.mxu0 %v2890_v22 }
 0x186   : > { %897 = vmatmul.f32.gmra.mxu2 %v2928_v45 }
 0x187   : > { %933 = vmatmul.f32.gmra.mxu3 %v2906_v18 }
 0x188   : > { %1238 = vmatmul.f32.gmra.mxu1 %v2944_v53 }
 0x18a   : > { %1196 = vmatmul.f32.gmra.mxu0 %v2928_v45 }
 0x18e   : > { %902 = vmatmul.f32.gmra.mxu2 %v2954_v1 }
 0x18f   : > { %939 = vmatmul.f32.gmra.mxu3 %v2944_v53 }
 0x190   : > { %1244 = vmatmul.f32.gmra.mxu1 %v2963_v57 }
 0x192   : > { %1201 = vmatmul.f32.gmra.mxu0 %v2954_v1 }
 0x196   : > { %1093 = vmatmul.f32.vlgmr.msrb.gmra.mxu2 %v2901_v34 }
 0x197   : > { %1479 = vmatpush.msrb.mxu2 %v2911_v26  ;;  %945 = vmatmul.f32.gmra.mxu3 %v2963_v57 }
 0x198   : > { %1447 = vmatmul.f32.vlgmr.msra.gmra.mxu1 %v2841_v4 }
 0x199   : > { %1818 = vmatpush.msra.mxu1 %v1682_v2  ;;  %1482 = vmatpush.msrb.mxu2 %v2899_v33 }
 0x19a   : > { %1392 = vmatmul.f32.vlgmr.msra.gmra.mxu0 %v2901_v34 }
 0x19b   : > { %1820 = vmatpush.msra.mxu1 %v1684_v15  ;;  %1778 = vmatpush.msra.mxu0 %v1734_v52 }
 0x19d   : > { %1781 = vmatpush.msra.mxu0 %v1740_v23 }
 0x19e   : > { %1101 = vmatmul.f32.gmra.mxu2 %v2941_v60 }
 0x19f   : > { %1148 = vmatmul.f32.vlgmr.msrb.gmra.mxu3 %v2841_v4 }
 0x1a0   : > { %1451 = vmatmul.f32.gmra.mxu1 %v2879_v6  ;;  %1519 = vmatpush.msrb.mxu3 %v2896_v10 }
 0x1a2   : > { %1521 = vmatpush.msrb.mxu3 %v2886_v16  ;;  %1400 = vmatmul.f32.gmra.mxu0 %v2941_v60  ;;  %v1741_v16 = vand.u32 4294901760, %v1740_v23 }
 0x1a4   : > { %v1742_v3 = vsub.f32 %v1740_v23, %v1741_v16 }
 0x1a6   : > { %1109 = vmatmul.f32.gmra.mxu2 %v2960_v12  ;;  %v1743_v5 = vand.u32 4294901760, %v1742_v3 }
 0x1a7   : > { %1152 = vmatmul.f32.gmra.mxu3 %v2879_v6 }
 0x1a8   : > { %1455 = vmatmul.f32.gmra.mxu1 %v2908_v21 }
 0x1aa   : > { %1408 = vmatmul.f32.gmra.mxu0 %v2960_v12 }
 0x1ae   : > { %1117 = vmatmul.f32.gmra.mxu2 %v2972_v14 }
 0x1af   : > { %1156 = vmatmul.f32.gmra.mxu3 %v2908_v21 }
 0x1b0   : > { %1459 = vmatmul.f32.gmra.mxu1 %v2946_v20 }
 0x1b2   : > { %1416 = vmatmul.f32.gmra.mxu0 %v2972_v14 }
 0x1b6   : > { %1271 = vmatmul.f32.vlgmr.msra.gmra.mxu2 %v2841_v4 }
 0x1b7   : > { %1683 = vmatpush.msra.mxu2 %v1682_v2  ;;  %1160 = vmatmul.f32.gmra.mxu3 %v2946_v20 }
 0x1b8   : > { %1605 = vmatmul.f32.vlgmr.msrb.gmra.mxu1 %v2841_v4 }
 0x1b9   : > { %1685 = vmatpush.msra.mxu2 %v1684_v15 }
 0x1ba   : > { %1570 = vmatmul.f32.vlgmr.msrb.gmra.mxu0 %v2841_v4 }
 0x1be   : > { %1275 = vmatmul.f32.gmra.mxu2 %v2879_v6 }
 0x1bf   : > { %1306 = vmatmul.f32.vlgmr.msra.gmra.mxu3 %v2841_v4 }
 0x1c0   : > { %1609 = vmatmul.f32.gmra.mxu1 %v2879_v6  ;;  %1738 = vmatpush.msra.mxu3 %v1737_v17 }
 0x1c2   : > { %1744 = vmatpush.msra.mxu3 %v1743_v5  ;;  %1574 = vmatmul.f32.gmra.mxu0 %v2879_v6 }
 0x1c6   : > { %1279 = vmatmul.f32.gmra.mxu2 %v2908_v21 }
 0x1c7   : > { %1310 = vmatmul.f32.gmra.mxu3 %v2879_v6 }
 0x1c8   : > { %1613 = vmatmul.f32.gmra.mxu1 %v2908_v21 }
 0x1ca   : > { %1578 = vmatmul.f32.gmra.mxu0 %v2908_v21 }
 0x1ce   : > { %1283 = vmatmul.f32.gmra.mxu2 %v2946_v20 }
 0x1cf   : > { %1314 = vmatmul.f32.gmra.mxu3 %v2908_v21 }
 0x1d0   : > { %1617 = vmatmul.f32.gmra.mxu1 %v2946_v20 }
 0x1d2   : > { %1582 = vmatmul.f32.gmra.mxu0 %v2946_v20  ;;  %v1008_v30 = vpop.f32.mrf.mxu1 }
 0x1d6   : > { %1485 = vmatmul.f32.vlgmr.msrb.gmra.mxu2 %v2857_v37 }
 0x1d7   : > { %1863 = vmatpush.msrb.mxu2 %v1735_v58  ;;  %1318 = vmatmul.f32.gmra.mxu3 %v2946_v20  ;;  %v973_v29 = vpop.f32.mrf.mxu0 }
 0x1d8   : > { %1824 = vmatmul.f32.vlgmr.msra.gmra.mxu1 %v2869_v55  ;;  %v795_v25 = vpop.f32.mrf.mxu2 }
 0x1d9   : > { %1867 = vmatpush.msrb.mxu2 %v1741_v16 }
 0x1da   : > { %1784 = vmatmul.f32.vlgmr.msra.gmra.mxu0 %v2857_v37 }
 0x1dd   : > { %v1012_v10 = vpop.f32.mrf.mxu1 }
 0x1de   : > { %1490 = vmatmul.f32.gmra.mxu2 %v2890_v22 }
 0x1df   : > { %1525 = vmatmul.f32.vlgmr.msrb.gmra.mxu3 %v2869_v55  ;;  %v977_v55 = vpop.f32.mrf.mxu0 }
 0x1e0   : > { %1830 = vmatmul.f32.gmra.mxu1 %v2906_v18  ;;  %1900 = vmatpush.msrb.mxu3 %v1682_v2 }
 0x1e1   : > { %v803_v27 = vpop.f32.mrf.mxu2 }
 0x1e2   : > { %1902 = vmatpush.msrb.mxu3 %v1684_v15  ;;  %v850_v9 = vpop.f32.mrf.mxu3  ;;  %1789 = vmatmul.f32.gmra.mxu0 %v2890_v22 }
 0x1e3   : > { %v851_v36 = vadd.f32 %v850_v9, %v795_v25 }
 0x1e5   : > { %v1016_v19 = vpop.f32.mrf.mxu1 }
 0x1e6   : > { %1495 = vmatmul.f32.gmra.mxu2 %v2928_v45 }
 0x1e7   : > { %1531 = vmatmul.f32.gmra.mxu3 %v2906_v18  ;;  %v981_v35 = vpop.f32.mrf.mxu0 }
 0x1e8   : > { %1836 = vmatmul.f32.gmra.mxu1 %v2944_v53 }
 0x1e9   : > { %v811_v37 = vpop.f32.mrf.mxu2 }
 0x1ea   : > { %v854_v31 = vpop.f32.mrf.mxu3  ;;  %1794 = vmatmul.f32.gmra.mxu0 %v2928_v45 }
 0x1eb   : > { %v855_v43 = vadd.f32 %v854_v31, %v803_v27 }
 0x1ee   : > { %1500 = vmatmul.f32.gmra.mxu2 %v2954_v1 }
 0x1ef   : > { %1537 = vmatmul.f32.gmra.mxu3 %v2944_v53  ;;  %v985_v40 = vpop.f32.mrf.mxu0 }
 0x1f0   : > { %1842 = vmatmul.f32.gmra.mxu1 %v2963_v57 }
 0x1f1   : > { %v819_v22 = vpop.f32.mrf.mxu2 }
 0x1f2   : > { %v858_v11 = vpop.f32.mrf.mxu3  ;;  %1799 = vmatmul.f32.gmra.mxu0 %v2954_v1 }
 0x1f3   : > { %v859_v54 = vadd.f32 %v858_v11, %v811_v37 }
 0x1f6   : > { %1691 = vmatmul.f32.vlgmr.msra.gmra.mxu2 %v2901_v34  ;;  %v1020_v34 = vpop.f32.mrf.mxu1 }
 0x1f7   : > { %1543 = vmatmul.f32.gmra.mxu3 %v2963_v57  ;;  %v1187_v49 = vpop.f32.mrf.mxu0 }
 0x1f9   : > { %v888_v33 = vpop.f32.mrf.mxu2 }
 0x1fa   : > { %v862_v18 = vpop.f32.mrf.mxu3  ;;  %v889_v38 = vadd.f32 %v888_v33, %v851_v36 }
 0x1fb   : > { %v863_v28 = vadd.f32 %v862_v18, %v819_v22 }
 0x1fe   : > { %1699 = vmatmul.f32.gmra.mxu2 %v2941_v60  ;;  %v1227_v51 = vpop.f32.mrf.mxu1 }
 0x1ff   : > { %1746 = vmatmul.f32.vlgmr.msra.gmra.mxu3 %v2841_v4  ;;  %v1192_v0 = vpop.f32.mrf.mxu0 }
 0x201   : > { %v893_v26 = vpop.f32.mrf.mxu2 }
 0x202   : > { %v928_v39 = vpop.f32.mrf.mxu3  ;;  %v894_v46 = vadd.f32 %v893_v26, %v855_v43 }
 0x203   : > { %v929_v41 = vadd.f32 %v928_v39, %v889_v38 }
 0x205   : > { %v974_v42 = vadd.f32 %v973_v29, %v929_v41 }
 0x206   : > { %1707 = vmatmul.f32.gmra.mxu2 %v2960_v12  ;;  %v1233_v7 = vpop.f32.mrf.mxu1 }
 0x207   : > { %v1009_v44 = vadd.f32 %v1008_v30, %v974_v42  ;;  %1750 = vmatmul.f32.gmra.mxu3 %v2879_v6  ;;  %v1197_v2 = vpop.f32.mrf.mxu0 }
 0x209   : > { %v898_v45 = vpop.f32.mrf.mxu2  ;;  %1023 = vst [vmem:[%s3068_s18] sm:$0xff] %v1009_v44 }
 0x20a   : > { %v934_v47 = vpop.f32.mrf.mxu3  ;;  %v899_v62 = vadd.f32 %v898_v45, %v859_v54 }
 0x20b   : > { %v935_v48 = vadd.f32 %v934_v47, %v894_v46 }
 0x20d   : > { %v978_v50 = vadd.f32 %v977_v55, %v935_v48 }
 0x20e   : > { %1715 = vmatmul.f32.gmra.mxu2 %v2972_v14  ;;  %v1239_v52 = vpop.f32.mrf.mxu1 }
 0x20f   : > { %v1013_v56 = vadd.f32 %v1012_v10, %v978_v50  ;;  %1754 = vmatmul.f32.gmra.mxu3 %v2908_v21  ;;  %v1202_v16 = vpop.f32.mrf.mxu0 }
 0x211   : > { %v903_v60 = vpop.f32.mrf.mxu2  ;;  %1024 = vst [vmem:[%s3068_s18 + $0x8] sm:$0xff] %v1013_v56 }
 0x212   : > { %v940_v53 = vpop.f32.mrf.mxu3  ;;  %v904_v8 = vadd.f32 %v903_v60, %v863_v28 }
 0x213   : > { %v941_v63 = vadd.f32 %v940_v53, %v899_v62 }
 0x215   : > { %v982_v32 = vadd.f32 %v981_v35, %v941_v63 }
 0x216   : > { %1869 = vmatmul.f32.vlgmr.msrb.gmra.mxu2 %v2841_v4  ;;  %v1245_v24 = vpop.f32.mrf.mxu1 }
 0x217   : > { %v1017_v61 = vadd.f32 %v1016_v19, %v982_v32  ;;  %1758 = vmatmul.f32.gmra.mxu3 %v2946_v20 }
 0x219   : > { %v1094_v1 = vpop.f32.mrf.mxu2  ;;  %1025 = vst [vmem:[%s3068_s18 + $0x10] sm:$0xff] %v1017_v61 }
 0x21a   : > { %v946_v12 = vpop.f32.mrf.mxu3 }
 0x21b   : > { %v947_v57 = vadd.f32 %v946_v12, %v904_v8 }
 0x21d   : > { %v986_v59 = vadd.f32 %v985_v40, %v947_v57 }
 0x21e   : > { %1873 = vmatmul.f32.gmra.mxu2 %v2879_v6  ;;  %v1448_v5 = vpop.f32.mrf.mxu1 }
 0x21f   : > { %v1021_v13 = vadd.f32 %v1020_v34, %v986_v59  ;;  %1904 = vmatmul.f32.vlgmr.msrb.gmra.mxu3 %v2841_v4  ;;  %v1393_v4 = vpop.f32.mrf.mxu0 }
 0x220   : > { %v1449_v60 = vadd.f32 %v1448_v5, %v1393_v4 }
 0x221   : > { %v1102_v14 = vpop.f32.mrf.mxu2  ;;  %1026 = vst [vmem:[%s3068_s18 + $0x18] sm:$0xff] %v1021_v13 }
 0x222   : > { %v1149_v15 = vpop.f32.mrf.mxu3 }
 0x223   : > { %v1150_v25 = vadd.f32 %v1149_v15, %v1094_v1 }
 0x225   : > { %v1188_v29 = vadd.f32 %v1187_v49, %v1150_v25 }
 0x226   : > { %1877 = vmatmul.f32.gmra.mxu2 %v2908_v21  ;;  %v1452_v55 = vpop.f32.mrf.mxu1 }
 0x227   : > { %1908 = vmatmul.f32.gmra.mxu3 %v2879_v6  ;;  %v1401_v6 = vpop.f32.mrf.mxu0  ;;  %v1228_v37 = vadd.f32 %v1227_v51, %v1188_v29 }
 0x228   : > { %v1453_v28 = vadd.f32 %v1452_v55, %v1401_v6 }
 0x229   : > { %v1110_v23 = vpop.f32.mrf.mxu2 }
 0x22a   : > { %v1153_v58 = vpop.f32.mrf.mxu3 }
 0x22b   : > { %v1154_v30 = vadd.f32 %v1153_v58, %v1102_v14 }
 0x22d   : > { %v1193_v11 = vadd.f32 %v1192_v0, %v1154_v30 }
 0x22e   : > { %1881 = vmatmul.f32.gmra.mxu2 %v2946_v20  ;;  %v1456_v26 = vpop.f32.mrf.mxu1 }
 0x22f   : > { %1912 = vmatmul.f32.gmra.mxu3 %v2908_v21  ;;  %v1234_v35 = vadd.f32 %v1233_v7, %v1193_v11  ;;  %v1409_v19 = vpop.f32.mrf.mxu0 }
 0x230   : > { %v1457_v14 = vadd.f32 %v1456_v26, %v1409_v19 }
 0x231   : > { %v1118_v3 = vpop.f32.mrf.mxu2 }
 0x232   : > { %v1157_v17 = vpop.f32.mrf.mxu3 }
 0x233   : > { %v1158_v33 = vadd.f32 %v1157_v17, %v1110_v23 }
 0x235   : > { %v1198_v39 = vadd.f32 %v1197_v2, %v1158_v33 }
 0x236   : > { %v1460_v47 = vpop.f32.mrf.mxu1 }
 0x237   : > { %1916 = vmatmul.f32.gmra.mxu3 %v2946_v20  ;;  %v1240_v41 = vadd.f32 %v1239_v52, %v1198_v39  ;;  %v1417_v44 = vpop.f32.mrf.mxu0 }
 0x238   : > { %v1461_v17 = vadd.f32 %v1460_v47, %v1417_v44 }
 0x239   : > { %v1272_v27 = vpop.f32.mrf.mxu2 }
 0x23a   : > { %v1161_v9 = vpop.f32.mrf.mxu3  ;;  %v1273_v22 = vadd.f32 %v1272_v27, %v1228_v37 }
 0x23b   : > { %v1162_v40 = vadd.f32 %v1161_v9, %v1118_v3 }
 0x23d   : > { %v1203_v46 = vadd.f32 %v1202_v16, %v1162_v40 }
 0x23e   : > { %v1606_v62 = vpop.f32.mrf.mxu1 }
 0x23f   : > { %v1246_v48 = vadd.f32 %v1245_v24, %v1203_v46  ;;  %v1571_v56 = vpop.f32.mrf.mxu0 }
 0x241   : > { %v1276_v31 = vpop.f32.mrf.mxu2 }
 0x242   : > { %v1307_v10 = vpop.f32.mrf.mxu3  ;;  %v1277_v20 = vadd.f32 %v1276_v31, %v1234_v35 }
 0x243   : > { %v1308_v21 = vadd.f32 %v1307_v10, %v1273_v22 }
 0x245   : > { %1322 = vst [vmem:[%s3068_s18 + $0x20] sm:$0xff] %v1308_v21 }
 0x246   : > { %v1610_v12 = vpop.f32.mrf.mxu1 }
 0x247   : > { %v1575_v1 = vpop.f32.mrf.mxu0 }
 0x249   : > { %v1280_v18 = vpop.f32.mrf.mxu2 }
 0x24a   : > { %v1311_v36 = vpop.f32.mrf.mxu3  ;;  %v1281_v42 = vadd.f32 %v1280_v18, %v1240_v41 }
 0x24b   : > { %v1312_v38 = vadd.f32 %v1311_v36, %v1277_v20 }
 0x24d   : > { %1323 = vst [vmem:[%s3068_s18 + $0x28] sm:$0xff] %v1312_v38 }
 0x24e   : > { %v1614_v24 = vpop.f32.mrf.mxu1 }
 0x24f   : > { %v1579_v23 = vpop.f32.mrf.mxu0 }
 0x251   : > { %v1284_v34 = vpop.f32.mrf.mxu2 }
 0x252   : > { %v1315_v43 = vpop.f32.mrf.mxu3  ;;  %v1285_v50 = vadd.f32 %v1284_v34, %v1246_v48 }
 0x253   : > { %v1316_v45 = vadd.f32 %v1315_v43, %v1281_v42 }
 0x255   : > { %1324 = vst [vmem:[%s3068_s18 + $0x30] sm:$0xff] %v1316_v45 }
 0x256   : > { %v1618_v30 = vpop.f32.mrf.mxu1 }
 0x257   : > { %v1583_v29 = vpop.f32.mrf.mxu0 }
 0x259   : > { %v1486_v49 = vpop.f32.mrf.mxu2 }
 0x25a   : > { %v1319_v51 = vpop.f32.mrf.mxu3  ;;  %v1487_v63 = vadd.f32 %v1486_v49, %v1449_v60 }
 0x25b   : > { %v1320_v54 = vadd.f32 %v1319_v51, %v1285_v50 }
 0x25d   : > { %1325 = vst [vmem:[%s3068_s18 + $0x38] sm:$0xff] %v1320_v54 }
 0x25e   : > { %v1825_v18 = vpop.f32.mrf.mxu1 }
 0x25f   : > { %v1785_v35 = vpop.f32.mrf.mxu0 }
 0x261   : > { %v1491_v53 = vpop.f32.mrf.mxu2 }
 0x262   : > { %v1526_v32 = vpop.f32.mrf.mxu3  ;;  %v1492_v57 = vadd.f32 %v1491_v53, %v1453_v28 }
 0x263   : > { %v1527_v0 = vadd.f32 %v1526_v32, %v1487_v63 }
 0x265   : > { %v1572_v61 = vadd.f32 %v1571_v56, %v1527_v0 }
 0x266   : > { %v1831_v41 = vpop.f32.mrf.mxu1 }
 0x267   : > { %v1607_v7 = vadd.f32 %v1606_v62, %v1572_v61  ;;  %v1790_v38 = vpop.f32.mrf.mxu0 }
 0x269   : > { %v1496_v8 = vpop.f32.mrf.mxu2  ;;  %1621 = vst [vmem:[%s3068_s18 + $0x40] sm:$0xff] %v1607_v7 }
 0x26a   : > { %v1532_v59 = vpop.f32.mrf.mxu3  ;;  %v1497_v58 = vadd.f32 %v1496_v8, %v1457_v14 }
 0x26b   : > { %v1533_v13 = vadd.f32 %v1532_v59, %v1492_v57 }
 0x26d   : > { %v1576_v2 = vadd.f32 %v1575_v1, %v1533_v13 }
 0x26e   : > { %v1837_v51 = vpop.f32.mrf.mxu1 }
 0x26f   : > { %v1611_v15 = vadd.f32 %v1610_v12, %v1576_v2  ;;  %v1795_v46 = vpop.f32.mrf.mxu0 }
 0x271   : > { %v1501_v52 = vpop.f32.mrf.mxu2  ;;  %1622 = vst [vmem:[%s3068_s18 + $0x48] sm:$0xff] %v1611_v15 }
 0x272   : > { %v1538_v16 = vpop.f32.mrf.mxu3  ;;  %v1502_v27 = vadd.f32 %v1501_v52, %v1461_v17 }
 0x273   : > { %v1539_v3 = vadd.f32 %v1538_v16, %v1497_v58 }
 0x275   : > { %v1580_v4 = vadd.f32 %v1579_v23, %v1539_v3 }
 0x276   : > { %v1843_v1 = vpop.f32.mrf.mxu1 }
 0x277   : > { %v1615_v5 = vadd.f32 %v1614_v24, %v1580_v4  ;;  %v1800_v63 = vpop.f32.mrf.mxu0 }
 0x279   : > { %v1692_v25 = vpop.f32.mrf.mxu2  ;;  %1623 = vst [vmem:[%s3068_s18 + $0x50] sm:$0xff] %v1615_v5 }
 0x27a   : > { %v1544_v9 = vpop.f32.mrf.mxu3 }
 0x27b   : > { %v1545_v6 = vadd.f32 %v1544_v9, %v1502_v27 }
 0x27d   : > { %v1584_v37 = vadd.f32 %v1583_v29, %v1545_v6 }
 0x27f   : > { %v1619_v31 = vadd.f32 %v1618_v30, %v1584_v37 }
 0x281   : > { %v1700_v55 = vpop.f32.mrf.mxu2  ;;  %1624 = vst [vmem:[%s3068_s18 + $0x58] sm:$0xff] %v1619_v31 }
 0x282   : > { %v1747_v22 = vpop.f32.mrf.mxu3 }
 0x283   : > { %v1748_v19 = vadd.f32 %v1747_v22, %v1692_v25 }
 0x285   : > { %v1786_v26 = vadd.f32 %v1785_v35, %v1748_v19 }
 0x287   : > { %v1826_v40 = vadd.f32 %v1825_v18, %v1786_v26 }
 0x289   : > { %v1708_v10 = vpop.f32.mrf.mxu2 }
 0x28a   : > { %v1751_v21 = vpop.f32.mrf.mxu3 }
 0x28b   : > { %v1752_v39 = vadd.f32 %v1751_v21, %v1700_v55 }
 0x28d   : > { %v1791_v45 = vadd.f32 %v1790_v38, %v1752_v39 }
 0x28f   : > { %v1832_v48 = vadd.f32 %v1831_v41, %v1791_v45 }
 0x291   : > { %v1716_v11 = vpop.f32.mrf.mxu2 }
 0x292   : > { %v1755_v33 = vpop.f32.mrf.mxu3 }
 0x293   : > { %v1756_v47 = vadd.f32 %v1755_v33, %v1708_v10 }
 0x295   : > { %v1796_v56 = vadd.f32 %v1795_v46, %v1756_v47 }
 0x297   : > { %v1838_v53 = vadd.f32 %v1837_v51, %v1796_v56 }
 0x299   : > { %v1870_v20 = vpop.f32.mrf.mxu2 }
 0x29a   : > { %v1759_v36 = vpop.f32.mrf.mxu3  ;;  %v1871_v34 = vadd.f32 %v1870_v20, %v1826_v40 }
 0x29b   : > { %v1760_v62 = vadd.f32 %v1759_v36, %v1716_v11 }
 0x29d   : > { %v1801_v61 = vadd.f32 %v1800_v63, %v1760_v62 }
 0x29f   : > { %v1844_v8 = vadd.f32 %v1843_v1, %v1801_v61 }
 0x2a1   : > { %v1874_v43 = vpop.f32.mrf.mxu2 }
 0x2a2   : > { %v1905_v42 = vpop.f32.mrf.mxu3  ;;  %v1875_v49 = vadd.f32 %v1874_v43, %v1832_v48 }
 0x2a3   : > { %v1906_v44 = vadd.f32 %v1905_v42, %v1871_v34 }
 0x2a5   : > { %1920 = vst [vmem:[%s3068_s18 + $0x60] sm:$0xff] %v1906_v44 }
 0x2a9   : > { %v1878_v60 = vpop.f32.mrf.mxu2 }
 0x2aa   : > { %v1909_v50 = vpop.f32.mrf.mxu3  ;;  %v1879_v32 = vadd.f32 %v1878_v60, %v1838_v53 }
 0x2ab   : > { %v1910_v54 = vadd.f32 %v1909_v50, %v1875_v49 }
 0x2ad   : > { %1921 = vst [vmem:[%s3068_s18 + $0x68] sm:$0xff] %v1910_v54 }
 0x2b1   : > { %v1882_v7 = vpop.f32.mrf.mxu2 }
 0x2b2   : > { %v1913_v0 = vpop.f32.mrf.mxu3  ;;  %v1883_v12 = vadd.f32 %v1882_v7, %v1844_v8 }
 0x2b3   : > { %v1914_v28 = vadd.f32 %v1913_v0, %v1879_v32 }
 0x2b5   : > { %1922 = vst [vmem:[%s3068_s18 + $0x70] sm:$0xff] %v1914_v28 }
 0x2ba   : > { %v1917_v57 = vpop.f32.mrf.mxu3 }
 0x2bb   : > { %v1918_v59 = vadd.f32 %v1917_v57, %v1883_v12 }
 0x2bd   : > { %1923 = vst [vmem:[%s3068_s18 + $0x78] sm:$0xff] %v1918_v59 }
 0x2be   : > { %2290 = shalt.err (!%p2287_p5)
}
 0x2bf   : > { %s2397_s8 = smov 128   ;;  %s2398_s18 = smov 8  }
 0x2c0   : > { %2079 = dma.vmem_to_hbm [thread:$0]  (%p2497_p6), %s1940_s7, 2048, %s1942_s22, %s1925_s10, %s2397_s8, %s2397_s8, %s2398_s18  }
 0x2c1 PF: > { %s3187_s14 = sld [smem:[#allocation14_spill]]  ;;  %p2096_p7 = scmp.ge.s32.totalorder %s2391_s28, 2 }
 0x2c3   : > { %p2090_p8 = pnand %p2096_p7, %p2503_p10 }
 0x2c5   : > { %p2091_p9 = pneg %p2090_p8 }
 0x2c7   : > { %s1956_s15 = sand.u32 1, %s3187_s14  }
 0x2c8   : > { %s1957_s4 = scalar_lea.sflag [#allocation6], %s1956_s15 }
 0x2c9   : > { %2346 = dma.done.wait (%p2091_p9), %s1957_s4, 2048  }
 0x2ca   : > { %2348 = vsyncadd (%p2091_p9), %s1957_s4, 4294965248  ;;  %s29_s28 = sadd.s32 1, %s2391_s28   ;;  %s3189_s24 = sld [smem:[#allocation15_spill]] }
 0x2cb   : > { %p26_p12 = scmp.ge.s32.totalorder %s29_s28, 6   ;;  %s3190_s26 = sld [smem:[#allocation18_spill]] }
 0x2cc   : > { %s3191_s29 = sld [smem:[#allocation19_spill]]  ;;  %s3192_s19 = smov %s2355_s20 }
 0x2cd   : > { %s3193_s20 = smov %s2359_s21  ;;  %s3194_s21 = smov %s2548_s2 }
 0x2ce   : > { %s3195_s22 = smov %s2367_s0  ;;  %s3196_s0 = smov %s2371_s23 }
 0x2cf   : > { %s3197_s23 = smov %s2545_s16  ;;  %s3198_s25 = smov %s2387_s27 }
 0x2d0   :  { %28 = sbr.rel (!%p26_p12) target bundleno = 17 (0x11), region = 81 }
 0x2d2   : > { %s3199_s27 = smov %s3191_s29 }
 0x2d5   :  { %1963 = vsyncpa [#allocation5], 1 }
 0x2d6   :  { %1965 = vsyncpa [#allocation5 + $0x1], 1 }
 0x2d7   :  { %1966 = vsyncpa [#allocation8], 1 }
 0x2d8   :  { %1967 = vsyncpa [#allocation6], 1 }
 0x2d9   :  { %1969 = vsyncpa [#allocation6 + $0x1], 1 }

</bundles_post_ra>
